<compile_context>
chip_gen: v6e
topology: v6e:2x2x1
jax: 0.10.0
libtpu: 0.0.40
codegen_flags: <defaults>
</compile_context>

<pallas_src>
import functools

import jax
import jax.numpy as jnp
from jax.experimental import pallas as pl
from jax.experimental.pallas import tpu as pltpu

HIDDEN = 20
N_HIDDEN_LAYERS = 9
SUB_MAX = 512  # max lanes per inner sub-chunk (bounds live vregs per chunk to ~24)


def _round_up(x, m):
    return ((x + m - 1) // m) * m


def _choose_tile(N, lane_tile):
    """Pick (block lanes L, sub-chunk lanes) so that L is lane-dense (mult of 128),
    divisible by the sub-chunk width, and the grid has ~2 blocks for v7x's two TCs."""
    if lane_tile >= SUB_MAX:
        lane_tile = _round_up(lane_tile, SUB_MAX)
    else:
        lane_tile = max(128, _round_up(lane_tile, 128))
    # Aim for >= 2 blocks (megacore sharding on v7x); never below one full 128-lane vreg.
    L = min(lane_tile, _round_up(max(pl.cdiv(N, 2), 128), 128))
    if L > SUB_MAX:
        L = _round_up(L, SUB_MAX)
    sub = min(SUB_MAX, L)
    return L, sub


def mlp_kernel(x_ref, w_in_ref, b_in_ref, w_h_ref, b_h_ref, w_out_ref, b_out_ref, o_ref, *, sub):
    L = x_ref.shape[1]
    n_sub = L // sub  # static

    # Small operands hoisted once per grid step (8 vregs total).
    w_in = w_in_ref[...]    # (20, 1)
    b_in = b_in_ref[...]    # (20, 1)
    w_out = w_out_ref[...]  # (1, 20)
    b_out = b_out_ref[...]  # (1, 1)

    # Static unroll over independent 512-lane sub-chunks: bounds vreg pressure per chunk
    # and lets the scheduler overlap chunk A's tanh (EUP) with chunk B's matmul (MXU).
    for c in range(n_sub):
        x = x_ref[:, pl.ds(c * sub, sub)]                       # (1, sub)

        # Input layer (fan_in = 1): broadcast FMA on the VPU, no MXU push needed.
        h = jnp.tanh(w_in * x + b_in)                           # (20, sub)

        # 9 hidden layers: (20,20) @ (20,sub) + (20,1), tanh. Hidden weights are
        # re-loaded per layer (cheap vld) rather than kept live across the chunk.
        for i in range(N_HIDDEN_LAYERS):
            w = w_h_ref[i]                                      # (20, 20)  (out, in)
            b = b_h_ref[i]                                      # (20, 1)
            h = jnp.tanh(jnp.dot(w, h, preferred_element_type=jnp.float32) + b)

        # Output layer: (1,20) @ (20,sub) + (1,1) -> lane-dense (1, sub) store.
        out = jnp.dot(w_out, h, preferred_element_type=jnp.float32) + b_out
        o_ref[:, pl.ds(c * sub, sub)] = out.astype(o_ref.dtype)


def function_approximator_pallas(x, params, *, lane_tile=1024):
    """x: (N, 1) float32. Ragged N is zero-padded up to n_blocks * L lanes."""
    w_in, b_in, w_h, b_h, w_out, b_out = params
    N = x.shape[0]
    L, sub = _choose_tile(N, lane_tile)
    n_blocks = pl.cdiv(N, L)
    N_pad = n_blocks * L

    # Batch along lanes: (N,1) -> (1, N_pad), zero-padded tail.
    x_flat = x.reshape(-1).astype(jnp.float32)
    x_row = jnp.pad(x_flat, (0, N_pad - N)).reshape(1, N_pad)

    def full(a):
        return pl.BlockSpec(a.shape, lambda i: (0,) * a.ndim)

    # Advisory cost for XLA scheduling around the custom call.
    flops = 2 * (HIDDEN + N_HIDDEN_LAYERS * HIDDEN * HIDDEN + HIDDEN) * N_pad
    transcendentals = (N_HIDDEN_LAYERS + 1) * HIDDEN * N_pad
    weight_bytes = sum(int(a.size) * a.dtype.itemsize for a in params)
    bytes_accessed = 8 * N_pad + weight_bytes

    out_row = pl.pallas_call(
        functools.partial(mlp_kernel, sub=sub),
        out_shape=jax.ShapeDtypeStruct((1, N_pad), jnp.float32),
        grid_spec=pltpu.PrefetchScalarGridSpec(
            num_scalar_prefetch=0,
            grid=(n_blocks,),
            in_specs=[
                pl.BlockSpec((1, L), lambda i: (0, i)),   # x block, lane-dense
                full(w_in),                               # (20, 1)
                full(b_in),                               # (20, 1)
                full(w_h),                                # (9, 20, 20)
                full(b_h),                                # (9, 20, 1)
                full(w_out),                              # (1, 20)
                full(b_out),                              # (1, 1)
            ],
            out_specs=pl.BlockSpec((1, L), lambda i: (0, i)),  # lane-dense output block
        ),
        compiler_params=pltpu.CompilerParams(dimension_semantics=("parallel",)),
        cost_estimate=pl.CostEstimate(
            flops=flops, transcendentals=transcendentals, bytes_accessed=bytes_accessed),
    )(x_row, w_in, b_in, w_h, b_h, w_out, b_out)

    return out_row.reshape(-1)[:N].reshape(N, 1)


def init_params(key):
    """Deterministic init mimicking nn.Linear default: U(-1/sqrt(fan_in), 1/sqrt(fan_in)).
    Weights stored in PyTorch layout (out_features, in_features); biases as (out, 1) columns."""
    ks = jax.random.split(key, 4 + 2 * N_HIDDEN_LAYERS)

    def linear(kw, kb, fan_in, fan_out):
        bound = 1.0 / jnp.sqrt(jnp.float32(fan_in))
        w = jax.random.uniform(kw, (fan_out, fan_in), jnp.float32, -bound, bound)
        b = jax.random.uniform(kb, (fan_out, 1), jnp.float32, -bound, bound)
        return w, b

    w_in, b_in = linear(ks[0], ks[1], 1, HIDDEN)        # (20,1), (20,1)
    w_h_list, b_h_list = [], []
    for l in range(N_HIDDEN_LAYERS):
        w, b = linear(ks[2 + 2 * l], ks[3 + 2 * l], HIDDEN, HIDDEN)
        w_h_list.append(w)
        b_h_list.append(b)
    w_h = jnp.stack(w_h_list, axis=0)                   # (9, 20, 20)
    b_h = jnp.stack(b_h_list, axis=0)                   # (9, 20, 1)
    w_out, b_out = linear(ks[-2], ks[-1], HIDDEN, 1)    # (1, 20), (1, 1)
    return w_in, b_in, w_h, b_h, w_out, b_out


def function_approximator_ref(x, params):
    """Pure-JAX reference matching nn.Linear semantics (weights stored (out, in))."""
    w_in, b_in, w_h, b_h, w_out, b_out = params
    h = jnp.tanh(x @ w_in.T + b_in.T)
    for i in range(N_HIDDEN_LAYERS):
        h = jnp.tanh(h @ w_h[i].T + b_h[i].T)
    return h @ w_out.T + b_out.T


if __name__ == "__main__":
    key = jax.random.PRNGKey(0)
    kp, kx = jax.random.split(key)

    params = init_params(kp)

    # Input consistent with generate_data(): a column of scalars, shape (N, 1).
    # N=2048 -> two 1024-lane blocks (both v7x TensorCores get work; cheap serial loop elsewhere).
    N = 2048
    x = jnp.linspace(0.0, 25.0, N, dtype=jnp.float32).reshape(N, 1)
    x = x + 0.01 * jax.random.normal(kx, (N, 1), jnp.float32)

    out = function_approximator_pallas(x, params)
    out = jax.block_until_ready(out)
    ref = function_approximator_ref(x, params)
    assert out.shape == (N, 1)
    assert jnp.allclose(out, ref, atol=5e-5, rtol=5e-5), "mismatch vs pure-JAX reference"

    # Ragged batch size exercises the zero-pad path and the >=2-block tile selection.
    N2 = 300
    x2 = jnp.linspace(0.0, 10.0, N2, dtype=jnp.float32).reshape(N2, 1)
    out2 = jax.block_until_ready(function_approximator_pallas(x2, params))
    ref2 = function_approximator_ref(x2, params)
    assert out2.shape == (N2, 1)
    assert jnp.allclose(out2, ref2, atol=5e-5, rtol=5e-5), "mismatch on ragged batch"

    print("KERNEL_OK")
</pallas_src>

<mosaic_0001>
module attributes {stable_mosaic.version = 11 : i64} {
  func.func @mlp_kernel(%arg0: i32, %arg1: memref<1x1024xf32, #tpu.memory_space<vmem>>, %arg2: memref<20x1xf32, #tpu.memory_space<vmem>>, %arg3: memref<20x1xf32, #tpu.memory_space<vmem>>, %arg4: memref<9x20x20xf32, #tpu.memory_space<vmem>>, %arg5: memref<9x20x1xf32, #tpu.memory_space<vmem>>, %arg6: memref<1x20xf32, #tpu.memory_space<vmem>>, %arg7: memref<1x1xf32, #tpu.memory_space<vmem>>, %arg8: memref<1x1024xf32, #tpu.memory_space<vmem>>) attributes {dimension_semantics = [#tpu.dimension_semantics<parallel>], iteration_bounds = array<i64: 2>, scalar_prefetch = 0 : i64, scratch_operands = 0 : i64, tpu.core_type = #tpu.core_type<tc>, window_params = [{transform_indices = @transform_0, window_bounds = array<i64: 1, 1024>}, {pipeline_mode = #tpu.pipeline_mode<synchronous>, transform_indices = @transform_1, window_bounds = array<i64: 20, 1>}, {pipeline_mode = #tpu.pipeline_mode<synchronous>, transform_indices = @transform_2, window_bounds = array<i64: 20, 1>}, {pipeline_mode = #tpu.pipeline_mode<synchronous>, transform_indices = @transform_3, window_bounds = array<i64: 9, 20, 20>}, {pipeline_mode = #tpu.pipeline_mode<synchronous>, transform_indices = @transform_4, window_bounds = array<i64: 9, 20, 1>}, {pipeline_mode = #tpu.pipeline_mode<synchronous>, transform_indices = @transform_5, window_bounds = array<i64: 1, 20>}, {pipeline_mode = #tpu.pipeline_mode<synchronous>, transform_indices = @transform_6, window_bounds = array<i64: 1, 1>}, {transform_indices = @transform_7, window_bounds = array<i64: 1, 1024>}]} {
    %c0 = arith.constant 0 : index
    %c0_0 = arith.constant 0 : index
    %0 = vector.load %arg2[%c0, %c0_0] : memref<20x1xf32, #tpu.memory_space<vmem>>, vector<20x1xf32>
    %c0_1 = arith.constant 0 : index
    %c0_2 = arith.constant 0 : index
    %1 = vector.load %arg3[%c0_1, %c0_2] : memref<20x1xf32, #tpu.memory_space<vmem>>, vector<20x1xf32>
    %c0_3 = arith.constant 0 : index
    %c0_4 = arith.constant 0 : index
    %2 = vector.load %arg6[%c0_3, %c0_4] : memref<1x20xf32, #tpu.memory_space<vmem>>, vector<1x20xf32>
    %c0_5 = arith.constant 0 : index
    %c0_6 = arith.constant 0 : index
    %3 = vector.load %arg7[%c0_5, %c0_6] : memref<1x1xf32, #tpu.memory_space<vmem>>, vector<1x1xf32>
    %c0_7 = arith.constant 0 : index
    %c0_8 = arith.constant 0 : index
    %4 = vector.load %arg1[%c0_7, %c0_8] : memref<1x1024xf32, #tpu.memory_space<vmem>>, vector<1x512xf32>
    %5 = vector.broadcast %0 : vector<20x1xf32> to vector<20x512xf32>
    %6 = vector.broadcast %4 : vector<1x512xf32> to vector<20x512xf32>
    %7 = arith.mulf %5, %6 : vector<20x512xf32>
    %8 = vector.broadcast %1 : vector<20x1xf32> to vector<20x512xf32>
    %9 = arith.addf %7, %8 : vector<20x512xf32>
    %10 = math.tanh %9 : vector<20x512xf32>
    %c0_9 = arith.constant 0 : index
    %c0_10 = arith.constant 0 : index
    %c0_11 = arith.constant 0 : index
    %11 = vector.load %arg4[%c0_9, %c0_10, %c0_11] : memref<9x20x20xf32, #tpu.memory_space<vmem>>, vector<1x20x20xf32>
    %12 = vector.shape_cast %11 : vector<1x20x20xf32> to vector<20x20xf32>
    %c0_12 = arith.constant 0 : index
    %c0_13 = arith.constant 0 : index
    %c0_14 = arith.constant 0 : index
    %13 = vector.load %arg5[%c0_12, %c0_13, %c0_14] : memref<9x20x1xf32, #tpu.memory_space<vmem>>, vector<1x20x1xf32>
    %14 = vector.shape_cast %13 : vector<1x20x1xf32> to vector<20x1xf32>
    %cst = arith.constant dense<0.000000e+00> : vector<20x512xf32>
    %15 = tpu.matmul %12, %10, %cst {dimension_numbers = #tpu.dot_dimension_numbers<[1], [0], [0], [1], [0, 0, 1, 1], [], []>} : vector<20x20xf32>, vector<20x512xf32>, vector<20x512xf32> -> vector<20x512xf32>
    %16 = vector.broadcast %14 : vector<20x1xf32> to vector<20x512xf32>
    %17 = arith.addf %15, %16 : vector<20x512xf32>
    %18 = math.tanh %17 : vector<20x512xf32>
    %c1 = arith.constant 1 : index
    %c0_15 = arith.constant 0 : index
    %c0_16 = arith.constant 0 : index
    %19 = vector.load %arg4[%c1, %c0_15, %c0_16] : memref<9x20x20xf32, #tpu.memory_space<vmem>>, vector<1x20x20xf32>
    %20 = vector.shape_cast %19 : vector<1x20x20xf32> to vector<20x20xf32>
    %c1_17 = arith.constant 1 : index
    %c0_18 = arith.constant 0 : index
    %c0_19 = arith.constant 0 : index
    %21 = vector.load %arg5[%c1_17, %c0_18, %c0_19] : memref<9x20x1xf32, #tpu.memory_space<vmem>>, vector<1x20x1xf32>
    %22 = vector.shape_cast %21 : vector<1x20x1xf32> to vector<20x1xf32>
    %cst_20 = arith.constant dense<0.000000e+00> : vector<20x512xf32>
    %23 = tpu.matmul %20, %18, %cst_20 {dimension_numbers = #tpu.dot_dimension_numbers<[1], [0], [0], [1], [0, 0, 1, 1], [], []>} : vector<20x20xf32>, vector<20x512xf32>, vector<20x512xf32> -> vector<20x512xf32>
    %24 = vector.broadcast %22 : vector<20x1xf32> to vector<20x512xf32>
    %25 = arith.addf %23, %24 : vector<20x512xf32>
    %26 = math.tanh %25 : vector<20x512xf32>
    %c2 = arith.constant 2 : index
    %c0_21 = arith.constant 0 : index
    %c0_22 = arith.constant 0 : index
    %27 = vector.load %arg4[%c2, %c0_21, %c0_22] : memref<9x20x20xf32, #tpu.memory_space<vmem>>, vector<1x20x20xf32>
    %28 = vector.shape_cast %27 : vector<1x20x20xf32> to vector<20x20xf32>
    %c2_23 = arith.constant 2 : index
    %c0_24 = arith.constant 0 : index
    %c0_25 = arith.constant 0 : index
    %29 = vector.load %arg5[%c2_23, %c0_24, %c0_25] : memref<9x20x1xf32, #tpu.memory_space<vmem>>, vector<1x20x1xf32>
    %30 = vector.shape_cast %29 : vector<1x20x1xf32> to vector<20x1xf32>
    %cst_26 = arith.constant dense<0.000000e+00> : vector<20x512xf32>
    %31 = tpu.matmul %28, %26, %cst_26 {dimension_numbers = #tpu.dot_dimension_numbers<[1], [0], [0], [1], [0, 0, 1, 1], [], []>} : vector<20x20xf32>, vector<20x512xf32>, vector<20x512xf32> -> vector<20x512xf32>
    %32 = vector.broadcast %30 : vector<20x1xf32> to vector<20x512xf32>
    %33 = arith.addf %31, %32 : vector<20x512xf32>
    %34 = math.tanh %33 : vector<20x512xf32>
    %c3 = arith.constant 3 : index
    %c0_27 = arith.constant 0 : index
    %c0_28 = arith.constant 0 : index
    %35 = vector.load %arg4[%c3, %c0_27, %c0_28] : memref<9x20x20xf32, #tpu.memory_space<vmem>>, vector<1x20x20xf32>
    %36 = vector.shape_cast %35 : vector<1x20x20xf32> to vector<20x20xf32>
    %c3_29 = arith.constant 3 : index
    %c0_30 = arith.constant 0 : index
    %c0_31 = arith.constant 0 : index
    %37 = vector.load %arg5[%c3_29, %c0_30, %c0_31] : memref<9x20x1xf32, #tpu.memory_space<vmem>>, vector<1x20x1xf32>
    %38 = vector.shape_cast %37 : vector<1x20x1xf32> to vector<20x1xf32>
    %cst_32 = arith.constant dense<0.000000e+00> : vector<20x512xf32>
    %39 = tpu.matmul %36, %34, %cst_32 {dimension_numbers = #tpu.dot_dimension_numbers<[1], [0], [0], [1], [0, 0, 1, 1], [], []>} : vector<20x20xf32>, vector<20x512xf32>, vector<20x512xf32> -> vector<20x512xf32>
    %40 = vector.broadcast %38 : vector<20x1xf32> to vector<20x512xf32>
    %41 = arith.addf %39, %40 : vector<20x512xf32>
    %42 = math.tanh %41 : vector<20x512xf32>
    %c4 = arith.constant 4 : index
    %c0_33 = arith.constant 0 : index
    %c0_34 = arith.constant 0 : index
    %43 = vector.load %arg4[%c4, %c0_33, %c0_34] : memref<9x20x20xf32, #tpu.memory_space<vmem>>, vector<1x20x20xf32>
    %44 = vector.shape_cast %43 : vector<1x20x20xf32> to vector<20x20xf32>
    %c4_35 = arith.constant 4 : index
    %c0_36 = arith.constant 0 : index
    %c0_37 = arith.constant 0 : index
    %45 = vector.load %arg5[%c4_35, %c0_36, %c0_37] : memref<9x20x1xf32, #tpu.memory_space<vmem>>, vector<1x20x1xf32>
    %46 = vector.shape_cast %45 : vector<1x20x1xf32> to vector<20x1xf32>
    %cst_38 = arith.constant dense<0.000000e+00> : vector<20x512xf32>
    %47 = tpu.matmul %44, %42, %cst_38 {dimension_numbers = #tpu.dot_dimension_numbers<[1], [0], [0], [1], [0, 0, 1, 1], [], []>} : vector<20x20xf32>, vector<20x512xf32>, vector<20x512xf32> -> vector<20x512xf32>
    %48 = vector.broadcast %46 : vector<20x1xf32> to vector<20x512xf32>
    %49 = arith.addf %47, %48 : vector<20x512xf32>
    %50 = math.tanh %49 : vector<20x512xf32>
    %c5 = arith.constant 5 : index
    %c0_39 = arith.constant 0 : index
    %c0_40 = arith.constant 0 : index
    %51 = vector.load %arg4[%c5, %c0_39, %c0_40] : memref<9x20x20xf32, #tpu.memory_space<vmem>>, vector<1x20x20xf32>
    %52 = vector.shape_cast %51 : vector<1x20x20xf32> to vector<20x20xf32>
    %c5_41 = arith.constant 5 : index
    %c0_42 = arith.constant 0 : index
    %c0_43 = arith.constant 0 : index
    %53 = vector.load %arg5[%c5_41, %c0_42, %c0_43] : memref<9x20x1xf32, #tpu.memory_space<vmem>>, vector<1x20x1xf32>
    %54 = vector.shape_cast %53 : vector<1x20x1xf32> to vector<20x1xf32>
    %cst_44 = arith.constant dense<0.000000e+00> : vector<20x512xf32>
    %55 = tpu.matmul %52, %50, %cst_44 {dimension_numbers = #tpu.dot_dimension_numbers<[1], [0], [0], [1], [0, 0, 1, 1], [], []>} : vector<20x20xf32>, vector<20x512xf32>, vector<20x512xf32> -> vector<20x512xf32>
    %56 = vector.broadcast %54 : vector<20x1xf32> to vector<20x512xf32>
    %57 = arith.addf %55, %56 : vector<20x512xf32>
    %58 = math.tanh %57 : vector<20x512xf32>
    %c6 = arith.constant 6 : index
    %c0_45 = arith.constant 0 : index
    %c0_46 = arith.constant 0 : index
    %59 = vector.load %arg4[%c6, %c0_45, %c0_46] : memref<9x20x20xf32, #tpu.memory_space<vmem>>, vector<1x20x20xf32>
    %60 = vector.shape_cast %59 : vector<1x20x20xf32> to vector<20x20xf32>
    %c6_47 = arith.constant 6 : index
    %c0_48 = arith.constant 0 : index
    %c0_49 = arith.constant 0 : index
    %61 = vector.load %arg5[%c6_47, %c0_48, %c0_49] : memref<9x20x1xf32, #tpu.memory_space<vmem>>, vector<1x20x1xf32>
    %62 = vector.shape_cast %61 : vector<1x20x1xf32> to vector<20x1xf32>
    %cst_50 = arith.constant dense<0.000000e+00> : vector<20x512xf32>
    %63 = tpu.matmul %60, %58, %cst_50 {dimension_numbers = #tpu.dot_dimension_numbers<[1], [0], [0], [1], [0, 0, 1, 1], [], []>} : vector<20x20xf32>, vector<20x512xf32>, vector<20x512xf32> -> vector<20x512xf32>
    %64 = vector.broadcast %62 : vector<20x1xf32> to vector<20x512xf32>
    %65 = arith.addf %63, %64 : vector<20x512xf32>
    %66 = math.tanh %65 : vector<20x512xf32>
    %c7 = arith.constant 7 : index
    %c0_51 = arith.constant 0 : index
    %c0_52 = arith.constant 0 : index
    %67 = vector.load %arg4[%c7, %c0_51, %c0_52] : memref<9x20x20xf32, #tpu.memory_space<vmem>>, vector<1x20x20xf32>
    %68 = vector.shape_cast %67 : vector<1x20x20xf32> to vector<20x20xf32>
    %c7_53 = arith.constant 7 : index
    %c0_54 = arith.constant 0 : index
    %c0_55 = arith.constant 0 : index
    %69 = vector.load %arg5[%c7_53, %c0_54, %c0_55] : memref<9x20x1xf32, #tpu.memory_space<vmem>>, vector<1x20x1xf32>
    %70 = vector.shape_cast %69 : vector<1x20x1xf32> to vector<20x1xf32>
    %cst_56 = arith.constant dense<0.000000e+00> : vector<20x512xf32>
    %71 = tpu.matmul %68, %66, %cst_56 {dimension_numbers = #tpu.dot_dimension_numbers<[1], [0], [0], [1], [0, 0, 1, 1], [], []>} : vector<20x20xf32>, vector<20x512xf32>, vector<20x512xf32> -> vector<20x512xf32>
    %72 = vector.broadcast %70 : vector<20x1xf32> to vector<20x512xf32>
    %73 = arith.addf %71, %72 : vector<20x512xf32>
    %74 = math.tanh %73 : vector<20x512xf32>
    %c8 = arith.constant 8 : index
    %c0_57 = arith.constant 0 : index
    %c0_58 = arith.constant 0 : index
    %75 = vector.load %arg4[%c8, %c0_57, %c0_58] : memref<9x20x20xf32, #tpu.memory_space<vmem>>, vector<1x20x20xf32>
    %76 = vector.shape_cast %75 : vector<1x20x20xf32> to vector<20x20xf32>
    %c8_59 = arith.constant 8 : index
    %c0_60 = arith.constant 0 : index
    %c0_61 = arith.constant 0 : index
    %77 = vector.load %arg5[%c8_59, %c0_60, %c0_61] : memref<9x20x1xf32, #tpu.memory_space<vmem>>, vector<1x20x1xf32>
    %78 = vector.shape_cast %77 : vector<1x20x1xf32> to vector<20x1xf32>
    %cst_62 = arith.constant dense<0.000000e+00> : vector<20x512xf32>
    %79 = tpu.matmul %76, %74, %cst_62 {dimension_numbers = #tpu.dot_dimension_numbers<[1], [0], [0], [1], [0, 0, 1, 1], [], []>} : vector<20x20xf32>, vector<20x512xf32>, vector<20x512xf32> -> vector<20x512xf32>
    %80 = vector.broadcast %78 : vector<20x1xf32> to vector<20x512xf32>
    %81 = arith.addf %79, %80 : vector<20x512xf32>
    %82 = math.tanh %81 : vector<20x512xf32>
    %cst_63 = arith.constant dense<0.000000e+00> : vector<1x512xf32>
    %83 = tpu.matmul %2, %82, %cst_63 {dimension_numbers = #tpu.dot_dimension_numbers<[1], [0], [0], [1], [0, 0, 1, 1], [], []>} : vector<1x20xf32>, vector<20x512xf32>, vector<1x512xf32> -> vector<1x512xf32>
    %84 = vector.broadcast %3 : vector<1x1xf32> to vector<1x512xf32>
    %85 = arith.addf %83, %84 : vector<1x512xf32>
    %c0_64 = arith.constant 0 : index
    %c0_65 = arith.constant 0 : index
    %86 = vector.load %arg8[%c0_64, %c0_65] : memref<1x1024xf32, #tpu.memory_space<vmem>>, vector<1x512xf32>
    tpu.vector_store %arg8[%c0_64, %c0_65], %85 {strides = array<i32>} : memref<1x1024xf32, #tpu.memory_space<vmem>>, vector<1x512xf32>,
    %c0_66 = arith.constant 0 : index
    %c512 = arith.constant 512 : index
    %87 = vector.load %arg1[%c0_66, %c512] : memref<1x1024xf32, #tpu.memory_space<vmem>>, vector<1x512xf32>
    %88 = vector.broadcast %0 : vector<20x1xf32> to vector<20x512xf32>
    %89 = vector.broadcast %87 : vector<1x512xf32> to vector<20x512xf32>
    %90 = arith.mulf %88, %89 : vector<20x512xf32>
    %91 = vector.broadcast %1 : vector<20x1xf32> to vector<20x512xf32>
    %92 = arith.addf %90, %91 : vector<20x512xf32>
    %93 = math.tanh %92 : vector<20x512xf32>
    %c0_67 = arith.constant 0 : index
    %c0_68 = arith.constant 0 : index
    %c0_69 = arith.constant 0 : index
    %94 = vector.load %arg4[%c0_67, %c0_68, %c0_69] : memref<9x20x20xf32, #tpu.memory_space<vmem>>, vector<1x20x20xf32>
    %95 = vector.shape_cast %94 : vector<1x20x20xf32> to vector<20x20xf32>
    %c0_70 = arith.constant 0 : index
    %c0_71 = arith.constant 0 : index
    %c0_72 = arith.constant 0 : index
    %96 = vector.load %arg5[%c0_70, %c0_71, %c0_72] : memref<9x20x1xf32, #tpu.memory_space<vmem>>, vector<1x20x1xf32>
    %97 = vector.shape_cast %96 : vector<1x20x1xf32> to vector<20x1xf32>
    %cst_73 = arith.constant dense<0.000000e+00> : vector<20x512xf32>
    %98 = tpu.matmul %95, %93, %cst_73 {dimension_numbers = #tpu.dot_dimension_numbers<[1], [0], [0], [1], [0, 0, 1, 1], [], []>} : vector<20x20xf32>, vector<20x512xf32>, vector<20x512xf32> -> vector<20x512xf32>
    %99 = vector.broadcast %97 : vector<20x1xf32> to vector<20x512xf32>
    %100 = arith.addf %98, %99 : vector<20x512xf32>
    %101 = math.tanh %100 : vector<20x512xf32>
    %c1_74 = arith.constant 1 : index
    %c0_75 = arith.constant 0 : index
    %c0_76 = arith.constant 0 : index
    %102 = vector.load %arg4[%c1_74, %c0_75, %c0_76] : memref<9x20x20xf32, #tpu.memory_space<vmem>>, vector<1x20x20xf32>
    %103 = vector.shape_cast %102 : vector<1x20x20xf32> to vector<20x20xf32>
    %c1_77 = arith.constant 1 : index
    %c0_78 = arith.constant 0 : index
    %c0_79 = arith.constant 0 : index
    %104 = vector.load %arg5[%c1_77, %c0_78, %c0_79] : memref<9x20x1xf32, #tpu.memory_space<vmem>>, vector<1x20x1xf32>
    %105 = vector.shape_cast %104 : vector<1x20x1xf32> to vector<20x1xf32>
    %cst_80 = arith.constant dense<0.000000e+00> : vector<20x512xf32>
    %106 = tpu.matmul %103, %101, %cst_80 {dimension_numbers = #tpu.dot_dimension_numbers<[1], [0], [0], [1], [0, 0, 1, 1], [], []>} : vector<20x20xf32>, vector<20x512xf32>, vector<20x512xf32> -> vector<20x512xf32>
    %107 = vector.broadcast %105 : vector<20x1xf32> to vector<20x512xf32>
    %108 = arith.addf %106, %107 : vector<20x512xf32>
    %109 = math.tanh %108 : vector<20x512xf32>
    %c2_81 = arith.constant 2 : index
    %c0_82 = arith.constant 0 : index
    %c0_83 = arith.constant 0 : index
    %110 = vector.load %arg4[%c2_81, %c0_82, %c0_83] : memref<9x20x20xf32, #tpu.memory_space<vmem>>, vector<1x20x20xf32>
    %111 = vector.shape_cast %110 : vector<1x20x20xf32> to vector<20x20xf32>
    %c2_84 = arith.constant 2 : index
    %c0_85 = arith.constant 0 : index
    %c0_86 = arith.constant 0 : index
    %112 = vector.load %arg5[%c2_84, %c0_85, %c0_86] : memref<9x20x1xf32, #tpu.memory_space<vmem>>, vector<1x20x1xf32>
    %113 = vector.shape_cast %112 : vector<1x20x1xf32> to vector<20x1xf32>
    %cst_87 = arith.constant dense<0.000000e+00> : vector<20x512xf32>
    %114 = tpu.matmul %111, %109, %cst_87 {dimension_numbers = #tpu.dot_dimension_numbers<[1], [0], [0], [1], [0, 0, 1, 1], [], []>} : vector<20x20xf32>, vector<20x512xf32>, vector<20x512xf32> -> vector<20x512xf32>
    %115 = vector.broadcast %113 : vector<20x1xf32> to vector<20x512xf32>
    %116 = arith.addf %114, %115 : vector<20x512xf32>
    %117 = math.tanh %116 : vector<20x512xf32>
    %c3_88 = arith.constant 3 : index
    %c0_89 = arith.constant 0 : index
    %c0_90 = arith.constant 0 : index
    %118 = vector.load %arg4[%c3_88, %c0_89, %c0_90] : memref<9x20x20xf32, #tpu.memory_space<vmem>>, vector<1x20x20xf32>
    %119 = vector.shape_cast %118 : vector<1x20x20xf32> to vector<20x20xf32>
    %c3_91 = arith.constant 3 : index
    %c0_92 = arith.constant 0 : index
    %c0_93 = arith.constant 0 : index
    %120 = vector.load %arg5[%c3_91, %c0_92, %c0_93] : memref<9x20x1xf32, #tpu.memory_space<vmem>>, vector<1x20x1xf32>
    %121 = vector.shape_cast %120 : vector<1x20x1xf32> to vector<20x1xf32>
    %cst_94 = arith.constant dense<0.000000e+00> : vector<20x512xf32>
    %122 = tpu.matmul %119, %117, %cst_94 {dimension_numbers = #tpu.dot_dimension_numbers<[1], [0], [0], [1], [0, 0, 1, 1], [], []>} : vector<20x20xf32>, vector<20x512xf32>, vector<20x512xf32> -> vector<20x512xf32>
    %123 = vector.broadcast %121 : vector<20x1xf32> to vector<20x512xf32>
    %124 = arith.addf %122, %123 : vector<20x512xf32>
    %125 = math.tanh %124 : vector<20x512xf32>
    %c4_95 = arith.constant 4 : index
    %c0_96 = arith.constant 0 : index
    %c0_97 = arith.constant 0 : index
    %126 = vector.load %arg4[%c4_95, %c0_96, %c0_97] : memref<9x20x20xf32, #tpu.memory_space<vmem>>, vector<1x20x20xf32>
    %127 = vector.shape_cast %126 : vector<1x20x20xf32> to vector<20x20xf32>
    %c4_98 = arith.constant 4 : index
    %c0_99 = arith.constant 0 : index
    %c0_100 = arith.constant 0 : index
    %128 = vector.load %arg5[%c4_98, %c0_99, %c0_100] : memref<9x20x1xf32, #tpu.memory_space<vmem>>, vector<1x20x1xf32>
    %129 = vector.shape_cast %128 : vector<1x20x1xf32> to vector<20x1xf32>
    %cst_101 = arith.constant dense<0.000000e+00> : vector<20x512xf32>
    %130 = tpu.matmul %127, %125, %cst_101 {dimension_numbers = #tpu.dot_dimension_numbers<[1], [0], [0], [1], [0, 0, 1, 1], [], []>} : vector<20x20xf32>, vector<20x512xf32>, vector<20x512xf32> -> vector<20x512xf32>
    %131 = vector.broadcast %129 : vector<20x1xf32> to vector<20x512xf32>
    %132 = arith.addf %130, %131 : vector<20x512xf32>
    %133 = math.tanh %132 : vector<20x512xf32>
    %c5_102 = arith.constant 5 : index
    %c0_103 = arith.constant 0 : index
    %c0_104 = arith.constant 0 : index
    %134 = vector.load %arg4[%c5_102, %c0_103, %c0_104] : memref<9x20x20xf32, #tpu.memory_space<vmem>>, vector<1x20x20xf32>
    %135 = vector.shape_cast %134 : vector<1x20x20xf32> to vector<20x20xf32>
    %c5_105 = arith.constant 5 : index
    %c0_106 = arith.constant 0 : index
    %c0_107 = arith.constant 0 : index
    %136 = vector.load %arg5[%c5_105, %c0_106, %c0_107] : memref<9x20x1xf32, #tpu.memory_space<vmem>>, vector<1x20x1xf32>
    %137 = vector.shape_cast %136 : vector<1x20x1xf32> to vector<20x1xf32>
    %cst_108 = arith.constant dense<0.000000e+00> : vector<20x512xf32>
    %138 = tpu.matmul %135, %133, %cst_108 {dimension_numbers = #tpu.dot_dimension_numbers<[1], [0], [0], [1], [0, 0, 1, 1], [], []>} : vector<20x20xf32>, vector<20x512xf32>, vector<20x512xf32> -> vector<20x512xf32>
    %139 = vector.broadcast %137 : vector<20x1xf32> to vector<20x512xf32>
    %140 = arith.addf %138, %139 : vector<20x512xf32>
    %141 = math.tanh %140 : vector<20x512xf32>
    %c6_109 = arith.constant 6 : index
    %c0_110 = arith.constant 0 : index
    %c0_111 = arith.constant 0 : index
    %142 = vector.load %arg4[%c6_109, %c0_110, %c0_111] : memref<9x20x20xf32, #tpu.memory_space<vmem>>, vector<1x20x20xf32>
    %143 = vector.shape_cast %142 : vector<1x20x20xf32> to vector<20x20xf32>
    %c6_112 = arith.constant 6 : index
    %c0_113 = arith.constant 0 : index
    %c0_114 = arith.constant 0 : index
    %144 = vector.load %arg5[%c6_112, %c0_113, %c0_114] : memref<9x20x1xf32, #tpu.memory_space<vmem>>, vector<1x20x1xf32>
    %145 = vector.shape_cast %144 : vector<1x20x1xf32> to vector<20x1xf32>
    %cst_115 = arith.constant dense<0.000000e+00> : vector<20x512xf32>
    %146 = tpu.matmul %143, %141, %cst_115 {dimension_numbers = #tpu.dot_dimension_numbers<[1], [0], [0], [1], [0, 0, 1, 1], [], []>} : vector<20x20xf32>, vector<20x512xf32>, vector<20x512xf32> -> vector<20x512xf32>
    %147 = vector.broadcast %145 : vector<20x1xf32> to vector<20x512xf32>
    %148 = arith.addf %146, %147 : vector<20x512xf32>
    %149 = math.tanh %148 : vector<20x512xf32>
    %c7_116 = arith.constant 7 : index
    %c0_117 = arith.constant 0 : index
    %c0_118 = arith.constant 0 : index
    %150 = vector.load %arg4[%c7_116, %c0_117, %c0_118] : memref<9x20x20xf32, #tpu.memory_space<vmem>>, vector<1x20x20xf32>
    %151 = vector.shape_cast %150 : vector<1x20x20xf32> to vector<20x20xf32>
    %c7_119 = arith.constant 7 : index
    %c0_120 = arith.constant 0 : index
    %c0_121 = arith.constant 0 : index
    %152 = vector.load %arg5[%c7_119, %c0_120, %c0_121] : memref<9x20x1xf32, #tpu.memory_space<vmem>>, vector<1x20x1xf32>
    %153 = vector.shape_cast %152 : vector<1x20x1xf32> to vector<20x1xf32>
    %cst_122 = arith.constant dense<0.000000e+00> : vector<20x512xf32>
    %154 = tpu.matmul %151, %149, %cst_122 {dimension_numbers = #tpu.dot_dimension_numbers<[1], [0], [0], [1], [0, 0, 1, 1], [], []>} : vector<20x20xf32>, vector<20x512xf32>, vector<20x512xf32> -> vector<20x512xf32>
    %155 = vector.broadcast %153 : vector<20x1xf32> to vector<20x512xf32>
    %156 = arith.addf %154, %155 : vector<20x512xf32>
    %157 = math.tanh %156 : vector<20x512xf32>
    %c8_123 = arith.constant 8 : index
    %c0_124 = arith.constant 0 : index
    %c0_125 = arith.constant 0 : index
    %158 = vector.load %arg4[%c8_123, %c0_124, %c0_125] : memref<9x20x20xf32, #tpu.memory_space<vmem>>, vector<1x20x20xf32>
    %159 = vector.shape_cast %158 : vector<1x20x20xf32> to vector<20x20xf32>
    %c8_126 = arith.constant 8 : index
    %c0_127 = arith.constant 0 : index
    %c0_128 = arith.constant 0 : index
    %160 = vector.load %arg5[%c8_126, %c0_127, %c0_128] : memref<9x20x1xf32, #tpu.memory_space<vmem>>, vector<1x20x1xf32>
    %161 = vector.shape_cast %160 : vector<1x20x1xf32> to vector<20x1xf32>
    %cst_129 = arith.constant dense<0.000000e+00> : vector<20x512xf32>
    %162 = tpu.matmul %159, %157, %cst_129 {dimension_numbers = #tpu.dot_dimension_numbers<[1], [0], [0], [1], [0, 0, 1, 1], [], []>} : vector<20x20xf32>, vector<20x512xf32>, vector<20x512xf32> -> vector<20x512xf32>
    %163 = vector.broadcast %161 : vector<20x1xf32> to vector<20x512xf32>
    %164 = arith.addf %162, %163 : vector<20x512xf32>
    %165 = math.tanh %164 : vector<20x512xf32>
    %cst_130 = arith.constant dense<0.000000e+00> : vector<1x512xf32>
    %166 = tpu.matmul %2, %165, %cst_130 {dimension_numbers = #tpu.dot_dimension_numbers<[1], [0], [0], [1], [0, 0, 1, 1], [], []>} : vector<1x20xf32>, vector<20x512xf32>, vector<1x512xf32> -> vector<1x512xf32>
    %167 = vector.broadcast %3 : vector<1x1xf32> to vector<1x512xf32>
    %168 = arith.addf %166, %167 : vector<1x512xf32>
    %c0_131 = arith.constant 0 : index
    %c512_132 = arith.constant 512 : index
    %169 = vector.load %arg8[%c0_131, %c512_132] : memref<1x1024xf32, #tpu.memory_space<vmem>>, vector<1x512xf32>
    tpu.vector_store %arg8[%c0_131, %c512_132], %168 {strides = array<i32>} : memref<1x1024xf32, #tpu.memory_space<vmem>>, vector<1x512xf32>,
    return
  }
  func.func @transform_0(%arg0: i32) -> (i32, i32) {
    %c0_i32 = arith.constant 0 : i32
    %c0_i32_0 = arith.constant 0 : i32
    return %c0_i32, %arg0 : i32, i32
  }
  func.func @transform_1(%arg0: i32) -> (i32, i32) {
    %c0_i32 = arith.constant 0 : i32
    %c0_i32_0 = arith.constant 0 : i32
    %c0_i32_1 = arith.constant 0 : i32
    return %c0_i32, %c0_i32_0 : i32, i32
  }
  func.func @transform_2(%arg0: i32) -> (i32, i32) {
    %c0_i32 = arith.constant 0 : i32
    %c0_i32_0 = arith.constant 0 : i32
    %c0_i32_1 = arith.constant 0 : i32
    return %c0_i32, %c0_i32_0 : i32, i32
  }
  func.func @transform_3(%arg0: i32) -> (i32, i32, i32) {
    %c0_i32 = arith.constant 0 : i32
    %c0_i32_0 = arith.constant 0 : i32
    %c0_i32_1 = arith.constant 0 : i32
    %c0_i32_2 = arith.constant 0 : i32
    return %c0_i32, %c0_i32_0, %c0_i32_1 : i32, i32, i32
  }
  func.func @transform_4(%arg0: i32) -> (i32, i32, i32) {
    %c0_i32 = arith.constant 0 : i32
    %c0_i32_0 = arith.constant 0 : i32
    %c0_i32_1 = arith.constant 0 : i32
    %c0_i32_2 = arith.constant 0 : i32
    return %c0_i32, %c0_i32_0, %c0_i32_1 : i32, i32, i32
  }
  func.func @transform_5(%arg0: i32) -> (i32, i32) {
    %c0_i32 = arith.constant 0 : i32
    %c0_i32_0 = arith.constant 0 : i32
    %c0_i32_1 = arith.constant 0 : i32
    return %c0_i32, %c0_i32_0 : i32, i32
  }
  func.func @transform_6(%arg0: i32) -> (i32, i32) {
    %c0_i32 = arith.constant 0 : i32
    %c0_i32_0 = arith.constant 0 : i32
    %c0_i32_1 = arith.constant 0 : i32
    return %c0_i32, %c0_i32_0 : i32, i32
  }
  func.func @transform_7(%arg0: i32) -> (i32, i32) {
    %c0_i32 = arith.constant 0 : i32
    %c0_i32_0 = arith.constant 0 : i32
    return %c0_i32, %arg0 : i32, i32
  }
}

</mosaic_0001>

<bundles_post_ra>
// kernel: tpu_custom_call.1
= control target key start
LH: loop header
LB: loop body
LE: loop exit
PB: predicated region body
PF: predicated region fallthrough
CT: control target
= control target key end

     0   :  { %s6688_s0 = inlined_call_operand.vmem [shape: f32[1,2048], index: 0, kind: input, shape index: {}]   ;;  %s6689_s1 = inlined_call_operand.vmem [shape: f32[20,1], index: 1, kind: input, shape index: {}]   ;;  %s6690_s2 = inlined_call_operand.vmem [shape: f32[20,1], index: 2, kind: input, shape index: {}]   ;;  %s6691_s3 = inlined_call_operand.vmem [shape: f32[9,20,20], index: 3, kind: input, shape index: {}]   ;;  %s6692_s4 = inlined_call_operand.vmem [shape: f32[9,20,1], index: 4, kind: input, shape index: {}]   ;;  %s6693_s5 = inlined_call_operand.vmem [shape: f32[1,20], index: 5, kind: input, shape index: {}]   ;;  %s6694_s6 = inlined_call_operand.<no memory space> [shape: f32[1,1], index: 6, kind: input, shape index: {}]   ;;  %s6695_s7 = inlined_call_operand.hbm [shape: f32[1,2048], index: 7, kind: output, shape index: {}]  }
   0x1   :  { %v12_v0 = vstv %s6694_s6 }
   0x2   :  { %13 = vst [vmem:[#allocation2] sm:$0x1] %v12_v0 }
   0x3   :  { %14 = vsyncpa [#allocation4], 0 }
   0x4   :  { %16 = vsyncpa [#allocation4 + $0x1], 0  ;;  %s5800_s26 = smov 0   ;;  %s5802_s27 = smov 0  }
   0x5   :  { %s5804_s28 = smov 0   ;;  %s5806_s29 = smov 0  }
   0x6 LB: > { %s5821_s6 = sadd.s32 4294967295, %s5751_s29   ;;  %s4866_s30 = sadd.s32 4294967294, %s5751_s29   ;;  %s5751_s29 = sphi %s5806_s29, %s6703_s29   ;;  %s5747_s28 = sphi %s5804_s28, %s6702_s28   ;;  %s5743_s27 = sphi %s5802_s27, %s6701_s27   ;;  %s5739_s26 = sphi %s5800_s26, %s6700_s26  }
   0x7   : > { %s5825_s8 = sadd.s32 1, %s5751_s29   ;;  %s181_s9 = sadd.s32 1, %s5747_s28 }
   0x8   : > { %s178_s10 = ssub.s32 %s5751_s29, %s5825_s8  ;;  %p191_p0 = scmp.ne.s32.totalorder %s5747_s28, %s5743_s27 }
   0x9   : > { %p179_p1 = scmp.eq.s32.totalorder %s178_s10, 0  ;;  %p192_p2 = scmp.eq.s32.totalorder %s5821_s6, 1 }
   0xa   : > { %p197_p3 = scmp.ne.s32.totalorder %s5743_s27, %s5739_s26  ;;  %p198_p4 = scmp.eq.s32.totalorder %s4866_s30, 1 }
   0xb   : > { %s5836_s11 = scalar_select %p179_p1, %s5747_s28, %s181_s9  }
   0xc   : > { %p5838_p5 = por %p192_p2, %p191_p0  ;;  %p5842_p6 = por %p198_p4, %p197_p3 }
   0xd   : > { %p4869_p7 = scmp.ge.s32.totalorder %s5751_s29, 1  ;;  %p242_p8 = scmp.lt.s32.totalorder %s5751_s29, 3 }
   0xf   : > { %p243_p9 = pnand %p4869_p7, %p242_p8 }
  0x10   : > { %s4871_s18 = sshll.u32 (!%p243_p9), %s5821_s6, 3  ;;  %s270_s17 = sand.u32 (!%p243_p9), 1, %s5743_s27  }
  0x11   : > { %246 = sbr.rel (%p243_p9) target bundleno = 4462 (0x116e), region = 48  ;;  %p274_p10 = scmp.lt.s32.totalorder (!%p243_p9), %s4871_s18, 15 }
  0x12   : > { %s4870_s20 = sshll.u32 (!%p243_p9), %s270_s17, 3  ;;  %s5165_s16 = sshll.u32 (!%p243_p9), %s5821_s6, 7 }
  0x13   : > { %s6377_s21 = scalar_lea.vmem (!%p243_p9), [#allocation3], %s4870_s20  ;;  %s4796_s24 = scalar_lea.sflag (!%p243_p9), [#allocation4], %s270_s17 }
  0x14   : > { %s4810_s20 = sshll.u32 (!%p243_p9), %s6377_s21, 4  ;;  %s5756_s6 = smov (!%p243_p9), [#allocation3]   ;;  %s4811_s20 = int_to_ptr.vmem [resolvable:$true] %s4810_s20 }
  0x15   : > { %s5691_s25 = scalar_lea.vmem (!%p243_p9), %s4811_s20, 128  ;;  %s5695_s30 = sshll.u32 (!%p243_p9), %s5756_s6, 4  ;;  %s5696_s30 = int_to_ptr.vmem [resolvable:$false] %s5695_s30 }
  0x16   : > { %v284_v1 = vld [vmem:[%s6690_s2 + $0x10] sm:$0xf]  ;;  %v5753_v3 = vmov 0   ;;  %v280_v4 = vld [vmem:[%s6689_s1 + $0x8] sm:$0xff]  ;;  %v279_v5 = vld [vmem:[%s6689_s1] sm:$0xff]  ;;  %v304_v6 = vlaneseq  ;;  %s6705_s18 = smov (!%p274_p10, %s4871_s18), 15  ;;  %p5692_p11 = scmp.ne.s32.totalorder %s4811_s20, %s5691_s25 }
  0x17   : > { %v281_v2 = vld [vmem:[%s6689_s1 + $0x10] sm:$0xf]  ;;  %5209 = vset.pattern.permute.xlu1 %v5753_v3  ;;  %5208 = vset.pattern.permute.xlu0 %v5753_v3  ;;  %v283_v7 = vld [vmem:[%s6690_s2 + $0x8] sm:$0xff]  ;;  %v282_v8 = vld [vmem:[%s6690_s2] sm:$0xff]  ;;  %s5882_s19 = scalar_lea.vmem %s6688_s0, %s6705_s18  ;;  %v5754_v35 = vmov 0.0   ;;  %vm406_vm0 = vcmask 1043456   ;;  %s4808_s18 = scalar_lea.hbm %s6695_s7, %s5165_s16 }
  0x18   : > { %348 = vperm.xlu1 %5209, %v284_v1   ;;  %300 = vperm.xlu0 %5208, %v281_v2   ;;  %v5868_v9 = vshrl.u32 %v304_v6, 7  ;;  %v380_v10 = vld [vmem:[%s6692_s4 + $0x10] sm:$0xf]  ;;  %v5876_v11 = vld [vmem:[%s6692_s4 + $0x8] sm:$0xff]  ;;  %v5888_v15 = vld [vmem:[%s5882_s19 + $0x4] sm:$0xf]  ;;  %p5693_p12 = pnand %p5692_p11, %p5838_p5  ;;  %p5698_p0 = scmp.lt.s32.totalorder %s4811_s20, %s5696_s30 }
  0x19   : > { %v378_v16 = vld [vmem:[%s6692_s4] sm:$0xff]  ;;  %v4887_v17 = vld [vmem:[%s6692_s4 + $0x28] sm:$0xf]  ;;  %v4885_v22 = vld [vmem:[%s6692_s4 + $0x18] sm:$0xff]  ;;  %483 = vmatprep.mubr.f32.mxu0 %v5754_v35  ;;  %566 = vmatprep.mubr.f32.mxu1 %v5754_v35  ;;  %vm396_vm1 = vcmask 162816   ;;  %vm6371_vm2 = vcmp.lt.s32.totalorder %v304_v6, 512 }
  0x1a   : > { %v310_v12 = vsub.s32 1, %v5868_v9  ;;  %v314_v13 = vsub.s32 2, %v5868_v9  ;;  %v318_v14 = vsub.s32 3, %v5868_v9  ;;  %v4886_v21 = vld [vmem:[%s6692_s4 + $0x20] sm:$0xff]  ;;  %v4902_v24 = vld [vmem:[%s6692_s4 + $0x38] sm:$0xff]  ;;  %v4901_v25 = vld [vmem:[%s6692_s4 + $0x30] sm:$0xff]  ;;  %p5694_p13 = pneg %p5693_p12 }
  0x1b   : > { %v4903_v23 = vld [vmem:[%s6692_s4 + $0x40] sm:$0xf]  ;;  %v4919_v26 = vld [vmem:[%s6692_s4 + $0x58] sm:$0xf]  ;;  %v4918_v27 = vld [vmem:[%s6692_s4 + $0x50] sm:$0xff]  ;;  %v6011_v54 = vsub.s32 0, %v5868_v9 }
  0x1c   : > { %295 = vperm.xlu0 %5208, %v280_v4   ;;  %290 = vperm.xlu1 %5209, %v279_v5   ;;  %v5899_v18 = vrot.slane %v5888_v15, %v310_v12  ;;  %v5904_v19 = vrot.slane %v5888_v15, %v314_v13  ;;  %v5909_v20 = vrot.slane %v5888_v15, %v318_v14  ;;  %v4917_v28 = vld [vmem:[%s6692_s4 + $0x48] sm:$0xff]  ;;  %v4935_v29 = vld [vmem:[%s6692_s4 + $0x70] sm:$0xf]  ;;  %v4933_v31 = vld [vmem:[%s6692_s4 + $0x60] sm:$0xff]  ;;  %s5697_s9 = scalar_lea.vmem %s5696_s30, 256 }
  0x1d   : > { %v4934_v30 = vld [vmem:[%s6692_s4 + $0x68] sm:$0xff]  ;;  %v4950_v33 = vld [vmem:[%s6692_s4 + $0x80] sm:$0xff]  ;;  %v4949_v34 = vld [vmem:[%s6692_s4 + $0x78] sm:$0xff]  ;;  %v2578_v56 = vrot.slane %v5888_v15, %v6011_v54  ;;  %p5699_p1 = scmp.lt.s32.totalorder %s5697_s9, %s5691_s25 }
  0x1e   : > { %v4951_v32 = vld [vmem:[%s6692_s4 + $0x88] sm:$0xf]  ;;  %v4967_v36 = vld [vmem:[%s6692_s4 + $0xa0] sm:$0xf]  ;;  %v4966_v37 = vld [vmem:[%s6692_s4 + $0x98] sm:$0xff] }
  0x1f   : > { %v4965_v38 = vld [vmem:[%s6692_s4 + $0x90] sm:$0xff]  ;;  %v4983_v39 = vld [vmem:[%s6692_s4 + $0xb8] sm:$0xf]  ;;  %v4981_v41 = vld [vmem:[%s6692_s4 + $0xa8] sm:$0xff]  ;;  %p5700_p2 = por %p5699_p1, %p5698_p0 }
  0x20   : > { %343 = vperm.xlu0 %5208, %v283_v7   ;;  %338 = vperm.xlu1 %5209, %v282_v8   ;;  %v4982_v40 = vld [vmem:[%s6692_s4 + $0xb0] sm:$0xff]  ;;  %v4998_v43 = vld [vmem:[%s6692_s4 + $0xc8] sm:$0xff]  ;;  %v4997_v44 = vld [vmem:[%s6692_s4 + $0xc0] sm:$0xff] }
  0x21   : > { %v4999_v42 = vld [vmem:[%s6692_s4 + $0xd0] sm:$0xf]  ;;  %v5031_v46 = vld [vmem:[%s6692_s4 + $0x28] sm:$0xf]  ;;  %v5047_v47 = vld [vmem:[%s6692_s4 + $0x40] sm:$0xf]  ;;  %p5701_p3 = pnand %p5700_p2, %p5694_p13 }
  0x22   : > { %v2636_v45 = vld [vmem:[%s6692_s4 + $0x10] sm:$0xf]  ;;  %v5063_v48 = vld [vmem:[%s6692_s4 + $0x58] sm:$0xf]  ;;  %v5095_v50 = vld [vmem:[%s6692_s4 + $0x88] sm:$0xf] }
  0x23   : > { %v5079_v49 = vld [vmem:[%s6692_s4 + $0x70] sm:$0xf]  ;;  %v5111_v51 = vld [vmem:[%s6692_s4 + $0xa0] sm:$0xf]  ;;  %v5127_v52 = vld [vmem:[%s6692_s4 + $0xb8] sm:$0xf] }
  0x24   : > { %393 = vperm.xlu0 %5208, %v380_v10   ;;  %388 = vperm.xlu1 %5209, %v5876_v11   ;;  %v5143_v53 = vld [vmem:[%s6692_s4 + $0xd0] sm:$0xf]  ;;  %v286_v55 = vld [vmem:[#allocation2] sm:$0x1] }
  0x28   : > { %383 = vperm.xlu0 %5208, %v378_v16   ;;  %617 = vperm.xlu1 %5209, %v4887_v17  }
  0x2c   : > { %612 = vperm.xlu0 %5208, %v4886_v21   ;;  %607 = vperm.xlu1 %5209, %v4885_v22  }
  0x30   : > { %839 = vperm.xlu0 %5208, %v4903_v23   ;;  %834 = vperm.xlu1 %5209, %v4902_v24  }
  0x34   : > { %829 = vperm.xlu0 %5208, %v4901_v25   ;;  %1061 = vperm.xlu1 %5209, %v4919_v26  }
  0x38   : > { %1056 = vperm.xlu0 %5208, %v4918_v27   ;;  %1051 = vperm.xlu1 %5209, %v4917_v28  }
  0x3c   : > { %1283 = vperm.xlu0 %5208, %v4935_v29   ;;  %1278 = vperm.xlu1 %5209, %v4934_v30  }
  0x40   : > { %1273 = vperm.xlu0 %5208, %v4933_v31   ;;  %1505 = vperm.xlu1 %5209, %v4951_v32  }
  0x44   : > { %1500 = vperm.xlu0 %5208, %v4950_v33   ;;  %1495 = vperm.xlu1 %5209, %v4949_v34  }
  0x48   : > { %1727 = vperm.xlu0 %5208, %v4967_v36   ;;  %1722 = vperm.xlu1 %5209, %v4966_v37  }
  0x4c   : > { %1717 = vperm.xlu0 %5208, %v4965_v38   ;;  %1949 = vperm.xlu1 %5209, %v4983_v39  }
  0x50   : > { %1944 = vperm.xlu0 %5208, %v4982_v40   ;;  %1939 = vperm.xlu1 %5209, %v4981_v41  }
  0x54   : > { %2171 = vperm.xlu0 %5208, %v4999_v42   ;;  %2166 = vperm.xlu1 %5209, %v4998_v43  }
  0x58   : > { %2161 = vperm.xlu0 %5208, %v4997_v44   ;;  %2649 = vperm.xlu1 %5209, %v2636_v45  }
  0x5c   : > { %2644 = vperm.xlu0 %5208, %v5876_v11   ;;  %2639 = vperm.xlu1 %5209, %v378_v16   ;;  %v287_v11 = vld [vmem:[%s5882_s19] sm:$0xf] }
  0x5d   : > { %v307_v23 = vrot.slane %v287_v11, %v6011_v54 }
  0x60   : > { %2869 = vperm.xlu0 %5208, %v5031_v46   ;;  %2864 = vperm.xlu1 %5209, %v4886_v21  }
  0x64   : > { %2859 = vperm.xlu0 %5208, %v4885_v22   ;;  %3089 = vperm.xlu1 %5209, %v5047_v47  }
  0x68   : > { %3084 = vperm.xlu0 %5208, %v4902_v24   ;;  %3079 = vperm.xlu1 %5209, %v4901_v25  }
  0x6c   : > { %3309 = vperm.xlu0 %5208, %v5063_v48   ;;  %3304 = vperm.xlu1 %5209, %v4918_v27   ;;  %v315_v27 = vrot.slane %v287_v11, %v314_v13  ;;  %v319_v13 = vrot.slane %v287_v11, %v318_v14 }
  0x70   : > { %3299 = vperm.xlu0 %5208, %v4917_v28   ;;  %3529 = vperm.xlu1 %5209, %v5079_v49  }
  0x74   : > { %3524 = vperm.xlu0 %5208, %v4934_v30   ;;  %3519 = vperm.xlu1 %5209, %v4933_v31  }
  0x78   : > { %3749 = vperm.xlu0 %5208, %v5095_v50   ;;  %3744 = vperm.xlu1 %5209, %v4950_v33   ;;  %v311_v33 = vrot.slane %v287_v11, %v310_v12  ;;  %v376_v11 = vld [vmem:[%s6691_s3 + $0x8] sm:$0xff] }
  0x7c   : > { %3739 = vperm.xlu0 %5208, %v4949_v34   ;;  %3969 = vperm.xlu1 %5209, %v5111_v51  }
  0x80   : > { %3964 = vperm.xlu0 %5208, %v4966_v37   ;;  %3959 = vperm.xlu1 %5209, %v4965_v38  }
  0x84   : > { %4189 = vperm.xlu0 %5208, %v5127_v52   ;;  %4184 = vperm.xlu1 %5209, %v4982_v40  }
  0x88   : > { %4179 = vperm.xlu0 %5208, %v4981_v41   ;;  %4409 = vperm.xlu1 %5209, %v5143_v53  }
  0x8c   : > { %4404 = vperm.xlu0 %5208, %v4998_v43   ;;  %4399 = vperm.xlu1 %5209, %v4997_v44  }
  0x90   : > { %2375 = vperm.xlu0 %5208, %v286_v55  }
  0x93   : > { %v349_v57 = vpop.permute.xlu1 %348  ;;  %v301_v58 = vpop.permute.xlu0 %300 }
  0x94   : > { %v2603_v59 = vmul.f32 %v2578_v56, %v301_v58  ;;  %v2604_v60 = vmul.f32 %v5899_v18, %v301_v58  ;;  %v2605_v61 = vmul.f32 %v5904_v19, %v301_v58  ;;  %v2606_v62 = vmul.f32 %v5909_v20, %v301_v58 }
  0x95   : > { %v334_v32 = vmul.f32 %v315_v27, %v301_v58  ;;  %v333_v39 = vmul.f32 %v311_v33, %v301_v58  ;;  %v335_v42 = vmul.f32 %v319_v13, %v301_v58 }
  0x96   : > { %v6018_v63 = vadd.f32 %v2603_v59, %v349_v57  ;;  %v6020_v0 = vadd.f32 %v2604_v60, %v349_v57  ;;  %v6022_v1 = vadd.f32 %v2605_v61, %v349_v57  ;;  %v6024_v2 = vadd.f32 %v2606_v62, %v349_v57 }
  0x97   : > { %v296_v3 = vpop.permute.xlu0 %295  ;;  %v291_v4 = vpop.permute.xlu1 %290  ;;  %v361_v37 = vadd.f32 %v349_v57, %v334_v32  ;;  %v360_v46 = vadd.f32 %v349_v57, %v333_v39  ;;  %v362_v12 = vadd.f32 %v349_v57, %v335_v42 }
  0x98   : > { %v2599_v5 = vmul.f32 %v2578_v56, %v296_v3  ;;  %v2600_v7 = vmul.f32 %v5899_v18, %v296_v3  ;;  %v2601_v8 = vmul.f32 %v5904_v19, %v296_v3  ;;  %v2602_v10 = vmul.f32 %v5909_v20, %v296_v3 }
  0x99   : > { %v2595_v16 = vmul.f32 %v2578_v56, %v291_v4  ;;  %v2596_v17 = vmul.f32 %v5899_v18, %v291_v4  ;;  %v2597_v21 = vmul.f32 %v5904_v19, %v291_v4  ;;  %v2598_v22 = vmul.f32 %v5909_v20, %v291_v4 }
  0x9a   : > { %v332_v20 = vmul.f32 %v307_v23, %v301_v58  ;;  %v328_v36 = vmul.f32 %v307_v23, %v296_v3  ;;  %v329_v38 = vmul.f32 %v311_v33, %v296_v3  ;;  %v331_v40 = vmul.f32 %v319_v13, %v296_v3 }
  0x9b   : > { %v344_v15 = vpop.permute.xlu0 %343  ;;  %v339_v26 = vpop.permute.xlu1 %338  ;;  %v330_v45 = vmul.f32 %v315_v27, %v296_v3  ;;  %v324_v47 = vmul.f32 %v307_v23, %v291_v4  ;;  %v325_v48 = vmul.f32 %v311_v33, %v291_v4  ;;  %v327_v14 = vmul.f32 %v319_v13, %v291_v4 }
  0x9c   : > { %v6034_v24 = vadd.f32 %v2599_v5, %v344_v15  ;;  %v6036_v25 = vadd.f32 %v2600_v7, %v344_v15  ;;  %v6040_v28 = vadd.f32 %v2601_v8, %v344_v15  ;;  %v6042_v29 = vadd.f32 %v2602_v10, %v344_v15  ;;  %v375_v7 = vld [vmem:[%s6691_s3] sm:$0xff] }
  0x9d   : > { %v6044_v30 = vadd.f32 %v2595_v16, %v339_v26  ;;  %v6046_v18 = vadd.f32 %v2596_v17, %v339_v26  ;;  %v6048_v19 = vadd.f32 %v2597_v21, %v339_v26  ;;  %v6050_v31 = vadd.f32 %v2598_v22, %v339_v26 }
  0x9e   : > { %v359_v34 = vadd.f32 %v349_v57, %v332_v20  ;;  %v355_v41 = vadd.f32 %v344_v15, %v328_v36  ;;  %v356_v43 = vadd.f32 %v344_v15, %v329_v38  ;;  %v358_v44 = vadd.f32 %v344_v15, %v331_v40 }
  0x9f   : > { %v357_v49 = vadd.f32 %v344_v15, %v330_v45  ;;  %v351_v50 = vadd.f32 %v339_v26, %v324_v47  ;;  %v326_v51 = vmul.f32 %v315_v27, %v291_v4  ;;  %v352_v52 = vadd.f32 %v339_v26, %v325_v48  ;;  %v377_v15 = vld [vmem:[%s6691_s3 + $0x10] sm:$0xf]  ;;  %v394_v16 = vpop.permute.xlu0 %393  ;;  %v389_v32 = vpop.permute.xlu1 %388 }
  0xa0   : > { %5210 = vtanh.f32 %v359_v34  ;;  %v354_v53 = vadd.f32 %v339_v26, %v327_v14 }
  0xa1   : > { %5212 = vtanh.f32 %v361_v37  ;;  %v353_v55 = vadd.f32 %v339_v26, %v326_v51 }
  0xa2   : > { %5214 = vtanh.f32 %v355_v41 }
  0xa3   : > { %5216 = vtanh.f32 %v356_v43  ;;  %v384_v23 = vpop.permute.xlu0 %383 }
  0xa4   : > { %5218 = vtanh.f32 %v358_v44 }
  0xa5   : > { %5220 = vtanh.f32 %v360_v46 }
  0xa6   : > { %5222 = vtanh.f32 %v362_v12 }
  0xa7   : > { %5224 = vtanh.f32 %v357_v49 }
  0xa8   : > { %5226 = vtanh.f32 %v351_v50 }
  0xa9   : > { %5228 = vtanh.f32 %v352_v52 }
  0xaa   : > { %5230 = vtanh.f32 %v354_v53 }
  0xab   : > { %5232 = vtanh.f32 %v353_v55 }
  0xad   : > { %v5211_v56 = vpop.eup %5210 }
  0xae   : > { %v5213_v58 = vpop.eup %5212 }
  0xaf   : > { %v5215_v57 = vpop.eup %5214 }
  0xb0   : > { %v5217_v59 = vpop.eup %5216 }
  0xb1   : > { %v5219_v60 = vpop.eup %5218 }
  0xb2   : > { %v5221_v61 = vpop.eup %5220 }
  0xb3   : > { %v5223_v62 = vpop.eup %5222  ;;  %4872 = vmatprep.subr.msk.mxu0 %vm406_vm0, %v5221_v61 }
  0xb4   : > { %v5225_v3 = vpop.eup %5224  ;;  %4877 = vmatprep.subr.msk.mxu1 %vm406_vm0, %v5223_v62  ;;  %4873 = vmatpush1.msk.msra.mxu0 %vm406_vm0, %v5211_v56 }
  0xb5   : > { %v5227_v4 = vpop.eup %5226  ;;  %4878 = vmatpush1.msk.msra.mxu1 %vm406_vm0, %v5213_v58  ;;  %447 = vmatprep.subr.mxu0 %v5217_v59 }
  0xb6   : > { %v5229_v5 = vpop.eup %5228  ;;  %530 = vmatprep.subr.mxu1 %v5219_v60  ;;  %448 = vmatpush1.msra.mxu0 %v5215_v57  ;;  %v4882_v60 = vld [vmem:[%s6691_s3 + $0x18] sm:$0xff] }
  0xb7   : > { %v5231_v8 = vpop.eup %5230  ;;  %531 = vmatpush1.msra.mxu1 %v5225_v3  ;;  %449 = vmatprep.subr.mxu0 %v5229_v5  ;;  %v4883_v3 = vld [vmem:[%s6691_s3 + $0x20] sm:$0xff]  ;;  %v618_v5 = vpop.permute.xlu1 %617 }
  0xb8   : > { %v5233_v10 = vpop.eup %5232  ;;  %532 = vmatprep.subr.mxu1 %v5231_v8  ;;  %450 = vmatpush1.msra.mxu0 %v5227_v4  ;;  %v4884_v4 = vld [vmem:[%s6691_s3 + $0x28] sm:$0xf] }
  0xb9   : > { %533 = vmatpush1.msra.mxu1 %v5233_v10  ;;  %4874 = vmatmul.mubr.msk.f32.vlgmr.msra.gmra.mxu0 %vm396_vm1, %v375_v7 }
  0xba   : > { %4879 = vmatmul.mubr.msk.f32.vlgmr.msra.gmra.mxu1 %vm396_vm1, %v375_v7  ;;  %489 = vmatprep.mubr.f32.mxu0 %v5754_v35 }
  0xbb   : > { %572 = vmatprep.mubr.f32.mxu1 %v5754_v35 }
  0xbd   : > { %4875 = vmatmul.mubr.msk.f32.gmra.mxu0 %vm396_vm1, %v376_v11 }
  0xbe   : > { %4880 = vmatmul.mubr.msk.f32.gmra.mxu1 %vm396_vm1, %v376_v11  ;;  %495 = vmatprep.mubr.f32.mxu0 %v5754_v35  ;;  %v608_v11 = vpop.permute.xlu1 %607 }
  0xbf   : > { %578 = vmatprep.mubr.f32.mxu1 %v5754_v35 }
  0xc1   : > { %4876 = vmatmul.mubr.msk.f32.gmra.mxu0 %vm396_vm1, %v377_v15 }
  0xc2   : > { %4881 = vmatmul.mubr.msk.f32.gmra.mxu1 %vm396_vm1, %v377_v15  ;;  %705 = vmatprep.mubr.f32.mxu0 %v5754_v35 }
  0xc3   : > { %788 = vmatprep.mubr.f32.mxu1 %v5754_v35 }
 0x179   : > { %v485_v17 = vpop.f32.mrf.mxu0 }
 0x17a   : > { %v568_v21 = vpop.f32.mrf.mxu1  ;;  %v486_v27 = vadd.f32 %v485_v17, %v384_v23 }
 0x17b   : > { %v487_v22 = vpop.f32.mrf.mxu0  ;;  %v569_v49 = vadd.f32 %v568_v21, %v384_v23  ;;  %v613_v21 = vpop.permute.xlu0 %612 }
 0x17c   : > { %v570_v26 = vpop.f32.mrf.mxu1  ;;  %v488_v33 = vadd.f32 %v487_v22, %v384_v23  ;;  %5234 = vtanh.f32 %v486_v27 }
 0x17d   : > { %v491_v20 = vpop.f32.mrf.mxu0  ;;  %v571_v48 = vadd.f32 %v570_v26, %v384_v23 }
 0x17e   : > { %v574_v13 = vpop.f32.mrf.mxu1  ;;  %v492_v34 = vadd.f32 %v491_v20, %v389_v32  ;;  %5236 = vtanh.f32 %v488_v33 }
 0x17f   : > { %v493_v36 = vpop.f32.mrf.mxu0  ;;  %v575_v12 = vadd.f32 %v574_v13, %v389_v32 }
 0x180   : > { %v494_v37 = vadd.f32 %v493_v36, %v389_v32  ;;  %v576_v38 = vpop.f32.mrf.mxu1  ;;  %5238 = vtanh.f32 %v492_v34 }
 0x181   : > { %v497_v39 = vpop.f32.mrf.mxu0  ;;  %v577_v46 = vadd.f32 %v576_v38, %v389_v32 }
 0x182   : > { %v498_v40 = vadd.f32 %v497_v39, %v394_v16  ;;  %v580_v41 = vpop.f32.mrf.mxu1  ;;  %5240 = vtanh.f32 %v494_v37 }
 0x183   : > { %v499_v42 = vpop.f32.mrf.mxu0  ;;  %v581_v43 = vadd.f32 %v580_v41, %v394_v16 }
 0x184   : > { %v500_v44 = vadd.f32 %v499_v42, %v394_v16  ;;  %v582_v45 = vpop.f32.mrf.mxu1  ;;  %5242 = vtanh.f32 %v498_v40 }
 0x185   : > { %v583_v47 = vadd.f32 %v582_v45, %v394_v16 }
 0x186   : > { %5244 = vtanh.f32 %v500_v44 }
 0x187   : > { %5246 = vtanh.f32 %v583_v47 }
 0x188   : > { %5248 = vtanh.f32 %v581_v43 }
 0x189   : > { %5250 = vtanh.f32 %v577_v46  ;;  %v5235_v14 = vpop.eup %5234 }
 0x18a   : > { %5252 = vtanh.f32 %v575_v12 }
 0x18b   : > { %5254 = vtanh.f32 %v571_v48  ;;  %v5237_v50 = vpop.eup %5236 }
 0x18c   : > { %5256 = vtanh.f32 %v569_v49 }
 0x18d   : > { %v5239_v51 = vpop.eup %5238 }
 0x18f   : > { %v5241_v52 = vpop.eup %5240 }
 0x191   : > { %v5243_v53 = vpop.eup %5242 }
 0x193   : > { %v5245_v55 = vpop.eup %5244 }
 0x194   : > { %v5247_v56 = vpop.eup %5246  ;;  %4888 = vmatprep.subr.msk.mxu0 %vm406_vm0, %v5245_v55 }
 0x195   : > { %v5249_v58 = vpop.eup %5248  ;;  %4893 = vmatprep.subr.msk.mxu1 %vm406_vm0, %v5247_v56  ;;  %4889 = vmatpush1.msk.msra.mxu0 %vm406_vm0, %v5243_v53  ;;  %v4898_v53 = vld [vmem:[%s6691_s3 + $0x30] sm:$0xff] }
 0x196   : > { %v5251_v57 = vpop.eup %5250  ;;  %4894 = vmatpush1.msk.msra.mxu1 %vm406_vm0, %v5249_v58  ;;  %669 = vmatprep.subr.mxu0 %v5241_v52  ;;  %v4899_v58 = vld [vmem:[%s6691_s3 + $0x38] sm:$0xff] }
 0x197   : > { %v5253_v59 = vpop.eup %5252  ;;  %752 = vmatprep.subr.mxu1 %v5251_v57  ;;  %670 = vmatpush1.msra.mxu0 %v5239_v51  ;;  %v4900_v57 = vld [vmem:[%s6691_s3 + $0x40] sm:$0xf] }
 0x198   : > { %v5255_v61 = vpop.eup %5254  ;;  %753 = vmatpush1.msra.mxu1 %v5253_v59  ;;  %671 = vmatprep.subr.mxu0 %v5237_v50  ;;  %v840_v59 = vpop.permute.xlu0 %839 }
 0x199   : > { %v5257_v62 = vpop.eup %5256  ;;  %754 = vmatprep.subr.mxu1 %v5255_v61  ;;  %672 = vmatpush1.msra.mxu0 %v5235_v14 }
 0x19a   : > { %755 = vmatpush1.msra.mxu1 %v5257_v62  ;;  %4890 = vmatmul.mubr.msk.f32.vlgmr.msra.gmra.mxu0 %vm396_vm1, %v4882_v60 }
 0x19b   : > { %4895 = vmatmul.mubr.msk.f32.vlgmr.msra.gmra.mxu1 %vm396_vm1, %v4882_v60  ;;  %711 = vmatprep.mubr.f32.mxu0 %v5754_v35 }
 0x19c   : > { %794 = vmatprep.mubr.f32.mxu1 %v5754_v35 }
 0x19e   : > { %4891 = vmatmul.mubr.msk.f32.gmra.mxu0 %vm396_vm1, %v4883_v3 }
 0x19f   : > { %4896 = vmatmul.mubr.msk.f32.gmra.mxu1 %vm396_vm1, %v4883_v3  ;;  %717 = vmatprep.mubr.f32.mxu0 %v5754_v35  ;;  %v830_v3 = vpop.permute.xlu0 %829 }
 0x1a0   : > { %800 = vmatprep.mubr.f32.mxu1 %v5754_v35 }
 0x1a2   : > { %4892 = vmatmul.mubr.msk.f32.gmra.mxu0 %vm396_vm1, %v4884_v4 }
 0x1a3   : > { %4897 = vmatmul.mubr.msk.f32.gmra.mxu1 %vm396_vm1, %v4884_v4  ;;  %927 = vmatprep.mubr.f32.mxu0 %v5754_v35 }
 0x1a4   : > { %1010 = vmatprep.mubr.f32.mxu1 %v5754_v35 }
 0x25a   : > { %v707_v7 = vpop.f32.mrf.mxu0 }
 0x25b   : > { %v790_v8 = vpop.f32.mrf.mxu1  ;;  %v708_v16 = vadd.f32 %v707_v7, %v608_v11 }
 0x25c   : > { %v709_v10 = vpop.f32.mrf.mxu0  ;;  %v791_v44 = vadd.f32 %v790_v8, %v608_v11  ;;  %v835_v8 = vpop.permute.xlu1 %834 }
 0x25d   : > { %v792_v15 = vpop.f32.mrf.mxu1  ;;  %v710_v22 = vadd.f32 %v709_v10, %v608_v11  ;;  %5258 = vtanh.f32 %v708_v16 }
 0x25e   : > { %v713_v17 = vpop.f32.mrf.mxu0  ;;  %v793_v43 = vadd.f32 %v792_v15, %v608_v11 }
 0x25f   : > { %v796_v23 = vpop.f32.mrf.mxu1  ;;  %v714_v26 = vadd.f32 %v713_v17, %v613_v21  ;;  %5260 = vtanh.f32 %v710_v22 }
 0x260   : > { %v715_v27 = vpop.f32.mrf.mxu0  ;;  %v797_v42 = vadd.f32 %v796_v23, %v613_v21 }
 0x261   : > { %v716_v20 = vadd.f32 %v715_v27, %v613_v21  ;;  %v798_v32 = vpop.f32.mrf.mxu1  ;;  %5262 = vtanh.f32 %v714_v26 }
 0x262   : > { %v719_v33 = vpop.f32.mrf.mxu0  ;;  %v799_v40 = vadd.f32 %v798_v32, %v613_v21 }
 0x263   : > { %v720_v13 = vadd.f32 %v719_v33, %v618_v5  ;;  %v802_v34 = vpop.f32.mrf.mxu1  ;;  %5264 = vtanh.f32 %v716_v20 }
 0x264   : > { %v721_v36 = vpop.f32.mrf.mxu0  ;;  %v803_v37 = vadd.f32 %v802_v34, %v618_v5 }
 0x265   : > { %v722_v38 = vadd.f32 %v721_v36, %v618_v5  ;;  %v804_v39 = vpop.f32.mrf.mxu1  ;;  %5266 = vtanh.f32 %v720_v13 }
 0x266   : > { %v805_v41 = vadd.f32 %v804_v39, %v618_v5 }
 0x267   : > { %5268 = vtanh.f32 %v722_v38 }
 0x268   : > { %5270 = vtanh.f32 %v805_v41 }
 0x269   : > { %5272 = vtanh.f32 %v803_v37 }
 0x26a   : > { %5274 = vtanh.f32 %v799_v40  ;;  %v5259_v45 = vpop.eup %5258 }
 0x26b   : > { %5276 = vtanh.f32 %v797_v42 }
 0x26c   : > { %5278 = vtanh.f32 %v793_v43  ;;  %v5261_v46 = vpop.eup %5260 }
 0x26d   : > { %5280 = vtanh.f32 %v791_v44 }
 0x26e   : > { %v5263_v47 = vpop.eup %5262 }
 0x270   : > { %v5265_v12 = vpop.eup %5264 }
 0x272   : > { %v5267_v48 = vpop.eup %5266 }
 0x274   : > { %v5269_v49 = vpop.eup %5268 }
 0x275   : > { %v5271_v14 = vpop.eup %5270  ;;  %4904 = vmatprep.subr.msk.mxu0 %vm406_vm0, %v5269_v49 }
 0x276   : > { %v5273_v50 = vpop.eup %5272  ;;  %4909 = vmatprep.subr.msk.mxu1 %vm406_vm0, %v5271_v14  ;;  %4905 = vmatpush1.msk.msra.mxu0 %vm406_vm0, %v5267_v48  ;;  %v4914_v48 = vld [vmem:[%s6691_s3 + $0x48] sm:$0xff] }
 0x277   : > { %v5275_v51 = vpop.eup %5274  ;;  %4910 = vmatpush1.msk.msra.mxu1 %vm406_vm0, %v5273_v50  ;;  %891 = vmatprep.subr.mxu0 %v5265_v12  ;;  %v4915_v50 = vld [vmem:[%s6691_s3 + $0x50] sm:$0xff] }
 0x278   : > { %v5277_v52 = vpop.eup %5276  ;;  %974 = vmatprep.subr.mxu1 %v5275_v51  ;;  %892 = vmatpush1.msra.mxu0 %v5263_v47  ;;  %v4916_v51 = vld [vmem:[%s6691_s3 + $0x58] sm:$0xf] }
 0x279   : > { %v5279_v55 = vpop.eup %5278  ;;  %975 = vmatpush1.msra.mxu1 %v5277_v52  ;;  %893 = vmatprep.subr.mxu0 %v5261_v46  ;;  %v1062_v52 = vpop.permute.xlu1 %1061 }
 0x27a   : > { %v5281_v56 = vpop.eup %5280  ;;  %976 = vmatprep.subr.mxu1 %v5279_v55  ;;  %894 = vmatpush1.msra.mxu0 %v5259_v45 }
 0x27b   : > { %977 = vmatpush1.msra.mxu1 %v5281_v56  ;;  %4906 = vmatmul.mubr.msk.f32.vlgmr.msra.gmra.mxu0 %vm396_vm1, %v4898_v53 }
 0x27c   : > { %4911 = vmatmul.mubr.msk.f32.vlgmr.msra.gmra.mxu1 %vm396_vm1, %v4898_v53  ;;  %933 = vmatprep.mubr.f32.mxu0 %v5754_v35 }
 0x27d   : > { %1016 = vmatprep.mubr.f32.mxu1 %v5754_v35 }
 0x27f   : > { %4907 = vmatmul.mubr.msk.f32.gmra.mxu0 %vm396_vm1, %v4899_v58 }
 0x280   : > { %4912 = vmatmul.mubr.msk.f32.gmra.mxu1 %vm396_vm1, %v4899_v58  ;;  %939 = vmatprep.mubr.f32.mxu0 %v5754_v35  ;;  %v1052_v58 = vpop.permute.xlu1 %1051 }
 0x281   : > { %1022 = vmatprep.mubr.f32.mxu1 %v5754_v35 }
 0x283   : > { %4908 = vmatmul.mubr.msk.f32.gmra.mxu0 %vm396_vm1, %v4900_v57 }
 0x284   : > { %4913 = vmatmul.mubr.msk.f32.gmra.mxu1 %vm396_vm1, %v4900_v57  ;;  %1149 = vmatprep.mubr.f32.mxu0 %v5754_v35 }
 0x285   : > { %1232 = vmatprep.mubr.f32.mxu1 %v5754_v35 }
 0x33b   : > { %v929_v60 = vpop.f32.mrf.mxu0 }
 0x33c   : > { %v1012_v61 = vpop.f32.mrf.mxu1  ;;  %v930_v5 = vadd.f32 %v929_v60, %v830_v3 }
 0x33d   : > { %v931_v62 = vpop.f32.mrf.mxu0  ;;  %v1013_v38 = vadd.f32 %v1012_v61, %v830_v3  ;;  %v1057_v61 = vpop.permute.xlu0 %1056 }
 0x33e   : > { %v1014_v4 = vpop.f32.mrf.mxu1  ;;  %v932_v10 = vadd.f32 %v931_v62, %v830_v3  ;;  %5282 = vtanh.f32 %v930_v5 }
 0x33f   : > { %v935_v7 = vpop.f32.mrf.mxu0  ;;  %v1015_v37 = vadd.f32 %v1014_v4, %v830_v3 }
 0x340   : > { %v1018_v11 = vpop.f32.mrf.mxu1  ;;  %v936_v15 = vadd.f32 %v935_v7, %v835_v8  ;;  %5284 = vtanh.f32 %v932_v10 }
 0x341   : > { %v937_v16 = vpop.f32.mrf.mxu0  ;;  %v1019_v36 = vadd.f32 %v1018_v11, %v835_v8 }
 0x342   : > { %v938_v17 = vadd.f32 %v937_v16, %v835_v8  ;;  %v1020_v21 = vpop.f32.mrf.mxu1  ;;  %5286 = vtanh.f32 %v936_v15 }
 0x343   : > { %v941_v22 = vpop.f32.mrf.mxu0  ;;  %v1021_v13 = vadd.f32 %v1020_v21, %v835_v8 }
 0x344   : > { %v942_v23 = vadd.f32 %v941_v22, %v840_v59  ;;  %v1024_v26 = vpop.f32.mrf.mxu1  ;;  %5288 = vtanh.f32 %v938_v17 }
 0x345   : > { %v943_v27 = vpop.f32.mrf.mxu0  ;;  %v1025_v20 = vadd.f32 %v1024_v26, %v840_v59 }
 0x346   : > { %v944_v32 = vadd.f32 %v943_v27, %v840_v59  ;;  %v1026_v33 = vpop.f32.mrf.mxu1  ;;  %5290 = vtanh.f32 %v942_v23 }
 0x347   : > { %v1027_v34 = vadd.f32 %v1026_v33, %v840_v59 }
 0x348   : > { %5292 = vtanh.f32 %v944_v32 }
 0x349   : > { %5294 = vtanh.f32 %v1027_v34 }
 0x34a   : > { %5296 = vtanh.f32 %v1025_v20 }
 0x34b   : > { %5298 = vtanh.f32 %v1021_v13  ;;  %v5283_v39 = vpop.eup %5282 }
 0x34c   : > { %5300 = vtanh.f32 %v1019_v36 }
 0x34d   : > { %5302 = vtanh.f32 %v1015_v37  ;;  %v5285_v40 = vpop.eup %5284 }
 0x34e   : > { %5304 = vtanh.f32 %v1013_v38 }
 0x34f   : > { %v5287_v41 = vpop.eup %5286 }
 0x351   : > { %v5289_v42 = vpop.eup %5288 }
 0x353   : > { %v5291_v43 = vpop.eup %5290 }
 0x355   : > { %v5293_v44 = vpop.eup %5292 }
 0x356   : > { %v5295_v45 = vpop.eup %5294  ;;  %4920 = vmatprep.subr.msk.mxu0 %vm406_vm0, %v5293_v44 }
 0x357   : > { %v5297_v46 = vpop.eup %5296  ;;  %4925 = vmatprep.subr.msk.mxu1 %vm406_vm0, %v5295_v45  ;;  %4921 = vmatpush1.msk.msra.mxu0 %vm406_vm0, %v5291_v43  ;;  %v4930_v43 = vld [vmem:[%s6691_s3 + $0x60] sm:$0xff] }
 0x358   : > { %v5299_v47 = vpop.eup %5298  ;;  %4926 = vmatpush1.msk.msra.mxu1 %vm406_vm0, %v5297_v46  ;;  %1113 = vmatprep.subr.mxu0 %v5289_v42  ;;  %v4931_v46 = vld [vmem:[%s6691_s3 + $0x68] sm:$0xff] }
 0x359   : > { %v5301_v12 = vpop.eup %5300  ;;  %1196 = vmatprep.subr.mxu1 %v5299_v47  ;;  %1114 = vmatpush1.msra.mxu0 %v5287_v41  ;;  %v4932_v47 = vld [vmem:[%s6691_s3 + $0x70] sm:$0xf] }
 0x35a   : > { %v5303_v49 = vpop.eup %5302  ;;  %1197 = vmatpush1.msra.mxu1 %v5301_v12  ;;  %1115 = vmatprep.subr.mxu0 %v5285_v40  ;;  %v1284_v12 = vpop.permute.xlu0 %1283 }
 0x35b   : > { %v5305_v14 = vpop.eup %5304  ;;  %1198 = vmatprep.subr.mxu1 %v5303_v49  ;;  %1116 = vmatpush1.msra.mxu0 %v5283_v39 }
 0x35c   : > { %1199 = vmatpush1.msra.mxu1 %v5305_v14  ;;  %4922 = vmatmul.mubr.msk.f32.vlgmr.msra.gmra.mxu0 %vm396_vm1, %v4914_v48 }
 0x35d   : > { %4927 = vmatmul.mubr.msk.f32.vlgmr.msra.gmra.mxu1 %vm396_vm1, %v4914_v48  ;;  %1155 = vmatprep.mubr.f32.mxu0 %v5754_v35 }
 0x35e   : > { %1238 = vmatprep.mubr.f32.mxu1 %v5754_v35 }
 0x360   : > { %4923 = vmatmul.mubr.msk.f32.gmra.mxu0 %vm396_vm1, %v4915_v50 }
 0x361   : > { %4928 = vmatmul.mubr.msk.f32.gmra.mxu1 %vm396_vm1, %v4915_v50  ;;  %1161 = vmatprep.mubr.f32.mxu0 %v5754_v35  ;;  %v1274_v50 = vpop.permute.xlu0 %1273 }
 0x362   : > { %1244 = vmatprep.mubr.f32.mxu1 %v5754_v35 }
 0x364   : > { %4924 = vmatmul.mubr.msk.f32.gmra.mxu0 %vm396_vm1, %v4916_v51 }
 0x365   : > { %4929 = vmatmul.mubr.msk.f32.gmra.mxu1 %vm396_vm1, %v4916_v51  ;;  %1371 = vmatprep.mubr.f32.mxu0 %v5754_v35 }
 0x366   : > { %1454 = vmatprep.mubr.f32.mxu1 %v5754_v35 }
 0x41c   : > { %v1151_v53 = vpop.f32.mrf.mxu0 }
 0x41d   : > { %v1234_v55 = vpop.f32.mrf.mxu1  ;;  %v1152_v59 = vadd.f32 %v1151_v53, %v1052_v58 }
 0x41e   : > { %v1153_v56 = vpop.f32.mrf.mxu0  ;;  %v1235_v32 = vadd.f32 %v1234_v55, %v1052_v58  ;;  %v1279_v55 = vpop.permute.xlu1 %1278 }
 0x41f   : > { %v1236_v57 = vpop.f32.mrf.mxu1  ;;  %v1154_v62 = vadd.f32 %v1153_v56, %v1052_v58  ;;  %5306 = vtanh.f32 %v1152_v59 }
 0x420   : > { %v1157_v60 = vpop.f32.mrf.mxu0  ;;  %v1237_v20 = vadd.f32 %v1236_v57, %v1052_v58 }
 0x421   : > { %v1240_v3 = vpop.f32.mrf.mxu1  ;;  %v1158_v4 = vadd.f32 %v1157_v60, %v1057_v61  ;;  %5308 = vtanh.f32 %v1154_v62 }
 0x422   : > { %v1159_v5 = vpop.f32.mrf.mxu0  ;;  %v1241_v27 = vadd.f32 %v1240_v3, %v1057_v61 }
 0x423   : > { %v1160_v7 = vadd.f32 %v1159_v5, %v1057_v61  ;;  %v1242_v8 = vpop.f32.mrf.mxu1  ;;  %5310 = vtanh.f32 %v1158_v4 }
 0x424   : > { %v1163_v10 = vpop.f32.mrf.mxu0  ;;  %v1243_v23 = vadd.f32 %v1242_v8, %v1057_v61 }
 0x425   : > { %v1164_v11 = vadd.f32 %v1163_v10, %v1062_v52  ;;  %v1246_v15 = vpop.f32.mrf.mxu1  ;;  %5312 = vtanh.f32 %v1160_v7 }
 0x426   : > { %v1165_v16 = vpop.f32.mrf.mxu0  ;;  %v1247_v17 = vadd.f32 %v1246_v15, %v1062_v52 }
 0x427   : > { %v1166_v21 = vadd.f32 %v1165_v16, %v1062_v52  ;;  %v1248_v22 = vpop.f32.mrf.mxu1  ;;  %5314 = vtanh.f32 %v1164_v11 }
 0x428   : > { %v1249_v26 = vadd.f32 %v1248_v22, %v1062_v52 }
 0x429   : > { %5316 = vtanh.f32 %v1166_v21 }
 0x42a   : > { %5318 = vtanh.f32 %v1249_v26 }
 0x42b   : > { %5320 = vtanh.f32 %v1247_v17 }
 0x42c   : > { %5322 = vtanh.f32 %v1243_v23  ;;  %v5307_v33 = vpop.eup %5306 }
 0x42d   : > { %5324 = vtanh.f32 %v1241_v27 }
 0x42e   : > { %5326 = vtanh.f32 %v1237_v20  ;;  %v5309_v13 = vpop.eup %5308 }
 0x42f   : > { %5328 = vtanh.f32 %v1235_v32 }
 0x430   : > { %v5311_v34 = vpop.eup %5310 }
 0x432   : > { %v5313_v36 = vpop.eup %5312 }
 0x434   : > { %v5315_v37 = vpop.eup %5314 }
 0x436   : > { %v5317_v38 = vpop.eup %5316 }
 0x437   : > { %v5319_v39 = vpop.eup %5318  ;;  %4936 = vmatprep.subr.msk.mxu0 %vm406_vm0, %v5317_v38 }
 0x438   : > { %v5321_v40 = vpop.eup %5320  ;;  %4941 = vmatprep.subr.msk.mxu1 %vm406_vm0, %v5319_v39  ;;  %4937 = vmatpush1.msk.msra.mxu0 %vm406_vm0, %v5315_v37  ;;  %v4946_v37 = vld [vmem:[%s6691_s3 + $0x78] sm:$0xff] }
 0x439   : > { %v5323_v41 = vpop.eup %5322  ;;  %4942 = vmatpush1.msk.msra.mxu1 %vm406_vm0, %v5321_v40  ;;  %1335 = vmatprep.subr.mxu0 %v5313_v36  ;;  %v4947_v40 = vld [vmem:[%s6691_s3 + $0x80] sm:$0xff] }
 0x43a   : > { %v5325_v42 = vpop.eup %5324  ;;  %1418 = vmatprep.subr.mxu1 %v5323_v41  ;;  %1336 = vmatpush1.msra.mxu0 %v5311_v34  ;;  %v4948_v41 = vld [vmem:[%s6691_s3 + $0x88] sm:$0xf] }
 0x43b   : > { %v5327_v44 = vpop.eup %5326  ;;  %1419 = vmatpush1.msra.mxu1 %v5325_v42  ;;  %1337 = vmatprep.subr.mxu0 %v5309_v13  ;;  %v1506_v42 = vpop.permute.xlu1 %1505 }
 0x43c   : > { %v5329_v45 = vpop.eup %5328  ;;  %1420 = vmatprep.subr.mxu1 %v5327_v44  ;;  %1338 = vmatpush1.msra.mxu0 %v5307_v33 }
 0x43d   : > { %1421 = vmatpush1.msra.mxu1 %v5329_v45  ;;  %4938 = vmatmul.mubr.msk.f32.vlgmr.msra.gmra.mxu0 %vm396_vm1, %v4930_v43 }
 0x43e   : > { %4943 = vmatmul.mubr.msk.f32.vlgmr.msra.gmra.mxu1 %vm396_vm1, %v4930_v43  ;;  %1377 = vmatprep.mubr.f32.mxu0 %v5754_v35 }
 0x43f   : > { %1460 = vmatprep.mubr.f32.mxu1 %v5754_v35 }
 0x441   : > { %4939 = vmatmul.mubr.msk.f32.gmra.mxu0 %vm396_vm1, %v4931_v46 }
 0x442   : > { %4944 = vmatmul.mubr.msk.f32.gmra.mxu1 %vm396_vm1, %v4931_v46  ;;  %1383 = vmatprep.mubr.f32.mxu0 %v5754_v35  ;;  %v1496_v46 = vpop.permute.xlu1 %1495 }
 0x443   : > { %1466 = vmatprep.mubr.f32.mxu1 %v5754_v35 }
 0x445   : > { %4940 = vmatmul.mubr.msk.f32.gmra.mxu0 %vm396_vm1, %v4932_v47 }
 0x446   : > { %4945 = vmatmul.mubr.msk.f32.gmra.mxu1 %vm396_vm1, %v4932_v47  ;;  %1593 = vmatprep.mubr.f32.mxu0 %v5754_v35 }
 0x447   : > { %1676 = vmatprep.mubr.f32.mxu1 %v5754_v35 }
 0x4fd   : > { %v1373_v48 = vpop.f32.mrf.mxu0 }
 0x4fe   : > { %v1456_v49 = vpop.f32.mrf.mxu1  ;;  %v1374_v52 = vadd.f32 %v1373_v48, %v1274_v50 }
 0x4ff   : > { %v1375_v14 = vpop.f32.mrf.mxu0  ;;  %v1457_v21 = vadd.f32 %v1456_v49, %v1274_v50  ;;  %v1501_v49 = vpop.permute.xlu0 %1500 }
 0x500   : > { %v1458_v51 = vpop.f32.mrf.mxu1  ;;  %v1376_v56 = vadd.f32 %v1375_v14, %v1274_v50  ;;  %5330 = vtanh.f32 %v1374_v52 }
 0x501   : > { %v1379_v53 = vpop.f32.mrf.mxu0  ;;  %v1459_v17 = vadd.f32 %v1458_v51, %v1274_v50 }
 0x502   : > { %v1462_v58 = vpop.f32.mrf.mxu1  ;;  %v1380_v57 = vadd.f32 %v1379_v53, %v1279_v55  ;;  %5332 = vtanh.f32 %v1376_v56 }
 0x503   : > { %v1381_v59 = vpop.f32.mrf.mxu0  ;;  %v1463_v16 = vadd.f32 %v1462_v58, %v1279_v55 }
 0x504   : > { %v1382_v60 = vadd.f32 %v1381_v59, %v1279_v55  ;;  %v1464_v61 = vpop.f32.mrf.mxu1  ;;  %5334 = vtanh.f32 %v1380_v57 }
 0x505   : > { %v1385_v62 = vpop.f32.mrf.mxu0  ;;  %v1465_v11 = vadd.f32 %v1464_v61, %v1279_v55 }
 0x506   : > { %v1386_v3 = vadd.f32 %v1385_v62, %v1284_v12  ;;  %v1468_v4 = vpop.f32.mrf.mxu1  ;;  %5336 = vtanh.f32 %v1382_v60 }
 0x507   : > { %v1387_v5 = vpop.f32.mrf.mxu0  ;;  %v1469_v7 = vadd.f32 %v1468_v4, %v1284_v12 }
 0x508   : > { %v1388_v8 = vadd.f32 %v1387_v5, %v1284_v12  ;;  %v1470_v10 = vpop.f32.mrf.mxu1  ;;  %5338 = vtanh.f32 %v1386_v3 }
 0x509   : > { %v1471_v15 = vadd.f32 %v1470_v10, %v1284_v12 }
 0x50a   : > { %5340 = vtanh.f32 %v1388_v8 }
 0x50b   : > { %5342 = vtanh.f32 %v1471_v15 }
 0x50c   : > { %5344 = vtanh.f32 %v1469_v7 }
 0x50d   : > { %5346 = vtanh.f32 %v1465_v11  ;;  %v5331_v22 = vpop.eup %5330 }
 0x50e   : > { %5348 = vtanh.f32 %v1463_v16 }
 0x50f   : > { %5350 = vtanh.f32 %v1459_v17  ;;  %v5333_v23 = vpop.eup %5332 }
 0x510   : > { %5352 = vtanh.f32 %v1457_v21 }
 0x511   : > { %v5335_v26 = vpop.eup %5334 }
 0x513   : > { %v5337_v27 = vpop.eup %5336 }
 0x515   : > { %v5339_v20 = vpop.eup %5338 }
 0x517   : > { %v5341_v32 = vpop.eup %5340 }
 0x518   : > { %v5343_v33 = vpop.eup %5342  ;;  %4952 = vmatprep.subr.msk.mxu0 %vm406_vm0, %v5341_v32 }
 0x519   : > { %v5345_v13 = vpop.eup %5344  ;;  %4957 = vmatprep.subr.msk.mxu1 %vm406_vm0, %v5343_v33  ;;  %4953 = vmatpush1.msk.msra.mxu0 %vm406_vm0, %v5339_v20  ;;  %v4962_v20 = vld [vmem:[%s6691_s3 + $0x90] sm:$0xff] }
 0x51a   : > { %v5347_v34 = vpop.eup %5346  ;;  %4958 = vmatpush1.msk.msra.mxu1 %vm406_vm0, %v5345_v13  ;;  %1557 = vmatprep.subr.mxu0 %v5337_v27  ;;  %v4963_v13 = vld [vmem:[%s6691_s3 + $0x98] sm:$0xff] }
 0x51b   : > { %v5349_v36 = vpop.eup %5348  ;;  %1640 = vmatprep.subr.mxu1 %v5347_v34  ;;  %1558 = vmatpush1.msra.mxu0 %v5335_v26  ;;  %v4964_v34 = vld [vmem:[%s6691_s3 + $0xa0] sm:$0xf] }
 0x51c   : > { %v5351_v38 = vpop.eup %5350  ;;  %1641 = vmatpush1.msra.mxu1 %v5349_v36  ;;  %1559 = vmatprep.subr.mxu0 %v5333_v23  ;;  %v1728_v36 = vpop.permute.xlu0 %1727 }
 0x51d   : > { %v5353_v39 = vpop.eup %5352  ;;  %1642 = vmatprep.subr.mxu1 %v5351_v38  ;;  %1560 = vmatpush1.msra.mxu0 %v5331_v22 }
 0x51e   : > { %1643 = vmatpush1.msra.mxu1 %v5353_v39  ;;  %4954 = vmatmul.mubr.msk.f32.vlgmr.msra.gmra.mxu0 %vm396_vm1, %v4946_v37 }
 0x51f   : > { %4959 = vmatmul.mubr.msk.f32.vlgmr.msra.gmra.mxu1 %vm396_vm1, %v4946_v37  ;;  %1599 = vmatprep.mubr.f32.mxu0 %v5754_v35 }
 0x520   : > { %1682 = vmatprep.mubr.f32.mxu1 %v5754_v35 }
 0x522   : > { %4955 = vmatmul.mubr.msk.f32.gmra.mxu0 %vm396_vm1, %v4947_v40 }
 0x523   : > { %4960 = vmatmul.mubr.msk.f32.gmra.mxu1 %vm396_vm1, %v4947_v40  ;;  %1605 = vmatprep.mubr.f32.mxu0 %v5754_v35  ;;  %v1718_v40 = vpop.permute.xlu0 %1717 }
 0x524   : > { %1688 = vmatprep.mubr.f32.mxu1 %v5754_v35 }
 0x526   : > { %4956 = vmatmul.mubr.msk.f32.gmra.mxu0 %vm396_vm1, %v4948_v41 }
 0x527   : > { %4961 = vmatmul.mubr.msk.f32.gmra.mxu1 %vm396_vm1, %v4948_v41  ;;  %1815 = vmatprep.mubr.f32.mxu0 %v5754_v35 }
 0x528   : > { %1898 = vmatprep.mubr.f32.mxu1 %v5754_v35 }
 0x5de   : > { %v1595_v43 = vpop.f32.mrf.mxu0 }
 0x5df   : > { %v1678_v44 = vpop.f32.mrf.mxu1  ;;  %v1596_v12 = vadd.f32 %v1595_v43, %v1496_v46 }
 0x5e0   : > { %v1597_v45 = vpop.f32.mrf.mxu0  ;;  %v1679_v8 = vadd.f32 %v1678_v44, %v1496_v46  ;;  %v1723_v44 = vpop.permute.xlu1 %1722 }
 0x5e1   : > { %v1680_v47 = vpop.f32.mrf.mxu1  ;;  %v1598_v14 = vadd.f32 %v1597_v45, %v1496_v46  ;;  %5354 = vtanh.f32 %v1596_v12 }
 0x5e2   : > { %v1601_v48 = vpop.f32.mrf.mxu0  ;;  %v1681_v7 = vadd.f32 %v1680_v47, %v1496_v46 }
 0x5e3   : > { %v1684_v50 = vpop.f32.mrf.mxu1  ;;  %v1602_v51 = vadd.f32 %v1601_v48, %v1501_v49  ;;  %5356 = vtanh.f32 %v1598_v14 }
 0x5e4   : > { %v1603_v52 = vpop.f32.mrf.mxu0  ;;  %v1685_v5 = vadd.f32 %v1684_v50, %v1501_v49 }
 0x5e5   : > { %v1604_v53 = vadd.f32 %v1603_v52, %v1501_v49  ;;  %v1686_v55 = vpop.f32.mrf.mxu1  ;;  %5358 = vtanh.f32 %v1602_v51 }
 0x5e6   : > { %v1607_v56 = vpop.f32.mrf.mxu0  ;;  %v1687_v3 = vadd.f32 %v1686_v55, %v1501_v49 }
 0x5e7   : > { %v1608_v58 = vadd.f32 %v1607_v56, %v1506_v42  ;;  %v1690_v57 = vpop.f32.mrf.mxu1  ;;  %5360 = vtanh.f32 %v1604_v53 }
 0x5e8   : > { %v1609_v59 = vpop.f32.mrf.mxu0  ;;  %v1691_v60 = vadd.f32 %v1690_v57, %v1506_v42 }
 0x5e9   : > { %v1610_v61 = vadd.f32 %v1609_v59, %v1506_v42  ;;  %v1692_v62 = vpop.f32.mrf.mxu1  ;;  %5362 = vtanh.f32 %v1608_v58 }
 0x5ea   : > { %v1693_v4 = vadd.f32 %v1692_v62, %v1506_v42 }
 0x5eb   : > { %5364 = vtanh.f32 %v1610_v61 }
 0x5ec   : > { %5366 = vtanh.f32 %v1693_v4 }
 0x5ed   : > { %5368 = vtanh.f32 %v1691_v60 }
 0x5ee   : > { %5370 = vtanh.f32 %v1687_v3  ;;  %v5355_v10 = vpop.eup %5354 }
 0x5ef   : > { %5372 = vtanh.f32 %v1685_v5 }
 0x5f0   : > { %5374 = vtanh.f32 %v1681_v7  ;;  %v5357_v11 = vpop.eup %5356 }
 0x5f1   : > { %5376 = vtanh.f32 %v1679_v8 }
 0x5f2   : > { %v5359_v15 = vpop.eup %5358 }
 0x5f4   : > { %v5361_v16 = vpop.eup %5360 }
 0x5f6   : > { %v5363_v17 = vpop.eup %5362 }
 0x5f8   : > { %v5365_v21 = vpop.eup %5364 }
 0x5f9   : > { %v5367_v22 = vpop.eup %5366  ;;  %4968 = vmatprep.subr.msk.mxu0 %vm406_vm0, %v5365_v21 }
 0x5fa   : > { %v5369_v23 = vpop.eup %5368  ;;  %4973 = vmatprep.subr.msk.mxu1 %vm406_vm0, %v5367_v22  ;;  %4969 = vmatpush1.msk.msra.mxu0 %vm406_vm0, %v5363_v17  ;;  %v4978_v17 = vld [vmem:[%s6691_s3 + $0xa8] sm:$0xff] }
 0x5fb   : > { %v5371_v26 = vpop.eup %5370  ;;  %4974 = vmatpush1.msk.msra.mxu1 %vm406_vm0, %v5369_v23  ;;  %1779 = vmatprep.subr.mxu0 %v5361_v16  ;;  %v4979_v23 = vld [vmem:[%s6691_s3 + $0xb0] sm:$0xff] }
 0x5fc   : > { %v5373_v27 = vpop.eup %5372  ;;  %1862 = vmatprep.subr.mxu1 %v5371_v26  ;;  %1780 = vmatpush1.msra.mxu0 %v5359_v15  ;;  %v4980_v26 = vld [vmem:[%s6691_s3 + $0xb8] sm:$0xf] }
 0x5fd   : > { %v5375_v32 = vpop.eup %5374  ;;  %1863 = vmatpush1.msra.mxu1 %v5373_v27  ;;  %1781 = vmatprep.subr.mxu0 %v5357_v11  ;;  %v1950_v27 = vpop.permute.xlu1 %1949 }
 0x5fe   : > { %v5377_v33 = vpop.eup %5376  ;;  %1864 = vmatprep.subr.mxu1 %v5375_v32  ;;  %1782 = vmatpush1.msra.mxu0 %v5355_v10 }
 0x5ff   : > { %1865 = vmatpush1.msra.mxu1 %v5377_v33  ;;  %4970 = vmatmul.mubr.msk.f32.vlgmr.msra.gmra.mxu0 %vm396_vm1, %v4962_v20 }
 0x600   : > { %4975 = vmatmul.mubr.msk.f32.vlgmr.msra.gmra.mxu1 %vm396_vm1, %v4962_v20  ;;  %1821 = vmatprep.mubr.f32.mxu0 %v5754_v35 }
 0x601   : > { %1904 = vmatprep.mubr.f32.mxu1 %v5754_v35 }
 0x603   : > { %4971 = vmatmul.mubr.msk.f32.gmra.mxu0 %vm396_vm1, %v4963_v13 }
 0x604   : > { %4976 = vmatmul.mubr.msk.f32.gmra.mxu1 %vm396_vm1, %v4963_v13  ;;  %1827 = vmatprep.mubr.f32.mxu0 %v5754_v35  ;;  %v1940_v13 = vpop.permute.xlu1 %1939 }
 0x605   : > { %1910 = vmatprep.mubr.f32.mxu1 %v5754_v35 }
 0x607   : > { %4972 = vmatmul.mubr.msk.f32.gmra.mxu0 %vm396_vm1, %v4964_v34 }
 0x608   : > { %4977 = vmatmul.mubr.msk.f32.gmra.mxu1 %vm396_vm1, %v4964_v34  ;;  %2037 = vmatprep.mubr.f32.mxu0 %v5754_v35 }
 0x609   : > { %2120 = vmatprep.mubr.f32.mxu1 %v5754_v35 }
 0x6bf   : > { %v1817_v37 = vpop.f32.mrf.mxu0 }
 0x6c0   : > { %v1900_v38 = vpop.f32.mrf.mxu1  ;;  %v1818_v42 = vadd.f32 %v1817_v37, %v1718_v40 }
 0x6c1   : > { %v1819_v39 = vpop.f32.mrf.mxu0  ;;  %v1901_v61 = vadd.f32 %v1900_v38, %v1718_v40  ;;  %v1945_v38 = vpop.permute.xlu0 %1944 }
 0x6c2   : > { %v1902_v41 = vpop.f32.mrf.mxu1  ;;  %v1820_v45 = vadd.f32 %v1819_v39, %v1718_v40  ;;  %5378 = vtanh.f32 %v1818_v42 }
 0x6c3   : > { %v1823_v43 = vpop.f32.mrf.mxu0  ;;  %v1903_v60 = vadd.f32 %v1902_v41, %v1718_v40 }
 0x6c4   : > { %v1906_v46 = vpop.f32.mrf.mxu1  ;;  %v1824_v47 = vadd.f32 %v1823_v43, %v1723_v44  ;;  %5380 = vtanh.f32 %v1820_v45 }
 0x6c5   : > { %v1825_v12 = vpop.f32.mrf.mxu0  ;;  %v1907_v59 = vadd.f32 %v1906_v46, %v1723_v44 }
 0x6c6   : > { %v1826_v48 = vadd.f32 %v1825_v12, %v1723_v44  ;;  %v1908_v49 = vpop.f32.mrf.mxu1  ;;  %5382 = vtanh.f32 %v1824_v47 }
 0x6c7   : > { %v1829_v14 = vpop.f32.mrf.mxu0  ;;  %v1909_v58 = vadd.f32 %v1908_v49, %v1723_v44 }
 0x6c8   : > { %v1830_v50 = vadd.f32 %v1829_v14, %v1728_v36  ;;  %v1912_v51 = vpop.f32.mrf.mxu1  ;;  %5384 = vtanh.f32 %v1826_v48 }
 0x6c9   : > { %v1831_v52 = vpop.f32.mrf.mxu0  ;;  %v1913_v53 = vadd.f32 %v1912_v51, %v1728_v36 }
 0x6ca   : > { %v1832_v55 = vadd.f32 %v1831_v52, %v1728_v36  ;;  %v1914_v56 = vpop.f32.mrf.mxu1  ;;  %5386 = vtanh.f32 %v1830_v50 }
 0x6cb   : > { %v1915_v57 = vadd.f32 %v1914_v56, %v1728_v36 }
 0x6cc   : > { %5388 = vtanh.f32 %v1832_v55 }
 0x6cd   : > { %5390 = vtanh.f32 %v1915_v57 }
 0x6ce   : > { %5392 = vtanh.f32 %v1913_v53 }
 0x6cf   : > { %5394 = vtanh.f32 %v1909_v58  ;;  %v5379_v62 = vpop.eup %5378 }
 0x6d0   : > { %5396 = vtanh.f32 %v1907_v59 }
 0x6d1   : > { %5398 = vtanh.f32 %v1903_v60  ;;  %v5381_v3 = vpop.eup %5380 }
 0x6d2   : > { %5400 = vtanh.f32 %v1901_v61 }
 0x6d3   : > { %v5383_v4 = vpop.eup %5382 }
 0x6d5   : > { %v5385_v5 = vpop.eup %5384 }
 0x6d7   : > { %v5387_v7 = vpop.eup %5386 }
 0x6d9   : > { %v5389_v8 = vpop.eup %5388 }
 0x6da   : > { %v5391_v10 = vpop.eup %5390  ;;  %4984 = vmatprep.subr.msk.mxu0 %vm406_vm0, %v5389_v8 }
 0x6db   : > { %v5393_v11 = vpop.eup %5392  ;;  %4989 = vmatprep.subr.msk.mxu1 %vm406_vm0, %v5391_v10  ;;  %4985 = vmatpush1.msk.msra.mxu0 %vm406_vm0, %v5387_v7  ;;  %v4994_v7 = vld [vmem:[%s6691_s3 + $0xc0] sm:$0xff] }
 0x6dc   : > { %v5395_v15 = vpop.eup %5394  ;;  %4990 = vmatpush1.msk.msra.mxu1 %vm406_vm0, %v5393_v11  ;;  %2001 = vmatprep.subr.mxu0 %v5385_v5  ;;  %v4995_v11 = vld [vmem:[%s6691_s3 + $0xc8] sm:$0xff] }
 0x6dd   : > { %v5397_v16 = vpop.eup %5396  ;;  %2084 = vmatprep.subr.mxu1 %v5395_v15  ;;  %2002 = vmatpush1.msra.mxu0 %v5383_v4  ;;  %v4996_v15 = vld [vmem:[%s6691_s3 + $0xd0] sm:$0xf] }
 0x6de   : > { %v5399_v21 = vpop.eup %5398  ;;  %2085 = vmatpush1.msra.mxu1 %v5397_v16  ;;  %2003 = vmatprep.subr.mxu0 %v5381_v3  ;;  %v2172_v16 = vpop.permute.xlu0 %2171 }
 0x6df   : > { %v5401_v22 = vpop.eup %5400  ;;  %2086 = vmatprep.subr.mxu1 %v5399_v21  ;;  %2004 = vmatpush1.msra.mxu0 %v5379_v62 }
 0x6e0   : > { %2087 = vmatpush1.msra.mxu1 %v5401_v22  ;;  %4986 = vmatmul.mubr.msk.f32.vlgmr.msra.gmra.mxu0 %vm396_vm1, %v4978_v17 }
 0x6e1   : > { %4991 = vmatmul.mubr.msk.f32.vlgmr.msra.gmra.mxu1 %vm396_vm1, %v4978_v17  ;;  %2043 = vmatprep.mubr.f32.mxu0 %v5754_v35 }
 0x6e2   : > { %2126 = vmatprep.mubr.f32.mxu1 %v5754_v35 }
 0x6e4   : > { %4987 = vmatmul.mubr.msk.f32.gmra.mxu0 %vm396_vm1, %v4979_v23 }
 0x6e5   : > { %4992 = vmatmul.mubr.msk.f32.gmra.mxu1 %vm396_vm1, %v4979_v23  ;;  %2049 = vmatprep.mubr.f32.mxu0 %v5754_v35  ;;  %v2162_v23 = vpop.permute.xlu0 %2161 }
 0x6e6   : > { %2132 = vmatprep.mubr.f32.mxu1 %v5754_v35 }
 0x6e8   : > { %4988 = vmatmul.mubr.msk.f32.gmra.mxu0 %vm396_vm1, %v4980_v26 }
 0x6e9   : > { %4993 = vmatmul.mubr.msk.f32.gmra.mxu1 %vm396_vm1, %v4980_v26  ;;  %2259 = vmatprep.mubr.f32.mxu0 %v5754_v35 }
 0x6ea   : > { %2342 = vmatprep.mubr.f32.mxu1 %v5754_v35 }
 0x7a0   : > { %v2039_v20 = vpop.f32.mrf.mxu0 }
 0x7a1   : > { %v2122_v32 = vpop.f32.mrf.mxu1  ;;  %v2040_v36 = vadd.f32 %v2039_v20, %v1940_v13 }
 0x7a2   : > { %v2041_v33 = vpop.f32.mrf.mxu0  ;;  %v2123_v55 = vadd.f32 %v2122_v32, %v1940_v13  ;;  %v2167_v32 = vpop.permute.xlu1 %2166 }
 0x7a3   : > { %v2124_v34 = vpop.f32.mrf.mxu1  ;;  %v2042_v39 = vadd.f32 %v2041_v33, %v1940_v13  ;;  %5402 = vtanh.f32 %v2040_v36 }
 0x7a4   : > { %v2045_v37 = vpop.f32.mrf.mxu0  ;;  %v2125_v53 = vadd.f32 %v2124_v34, %v1940_v13 }
 0x7a5   : > { %v2128_v40 = vpop.f32.mrf.mxu1  ;;  %v2046_v41 = vadd.f32 %v2045_v37, %v1945_v38  ;;  %5404 = vtanh.f32 %v2042_v39 }
 0x7a6   : > { %v2047_v42 = vpop.f32.mrf.mxu0  ;;  %v2129_v52 = vadd.f32 %v2128_v40, %v1945_v38 }
 0x7a7   : > { %v2048_v43 = vadd.f32 %v2047_v42, %v1945_v38  ;;  %v2130_v44 = vpop.f32.mrf.mxu1  ;;  %5406 = vtanh.f32 %v2046_v41 }
 0x7a8   : > { %v2051_v45 = vpop.f32.mrf.mxu0  ;;  %v2131_v50 = vadd.f32 %v2130_v44, %v1945_v38 }
 0x7a9   : > { %v2052_v46 = vadd.f32 %v2051_v45, %v1950_v27  ;;  %v2134_v47 = vpop.f32.mrf.mxu1  ;;  %5408 = vtanh.f32 %v2048_v43 }
 0x7aa   : > { %v2053_v12 = vpop.f32.mrf.mxu0  ;;  %v2135_v48 = vadd.f32 %v2134_v47, %v1950_v27 }
 0x7ab   : > { %v2054_v49 = vadd.f32 %v2053_v12, %v1950_v27  ;;  %v2136_v14 = vpop.f32.mrf.mxu1  ;;  %5410 = vtanh.f32 %v2052_v46 }
 0x7ac   : > { %v2137_v51 = vadd.f32 %v2136_v14, %v1950_v27 }
 0x7ad   : > { %5412 = vtanh.f32 %v2054_v49 }
 0x7ae   : > { %5414 = vtanh.f32 %v2137_v51 }
 0x7af   : > { %5416 = vtanh.f32 %v2135_v48 }
 0x7b0   : > { %5418 = vtanh.f32 %v2131_v50  ;;  %v5403_v56 = vpop.eup %5402 }
 0x7b1   : > { %5420 = vtanh.f32 %v2129_v52 }
 0x7b2   : > { %5422 = vtanh.f32 %v2125_v53  ;;  %v5405_v58 = vpop.eup %5404 }
 0x7b3   : > { %5424 = vtanh.f32 %v2123_v55 }
 0x7b4   : > { %v5407_v57 = vpop.eup %5406  ;;  %5426 = vtanh.f32 %v6018_v63 }
 0x7b5   : > { %5428 = vtanh.f32 %v6020_v0 }
 0x7b6   : > { %v5409_v59 = vpop.eup %5408  ;;  %5430 = vtanh.f32 %v6022_v1 }
 0x7b7   : > { %5432 = vtanh.f32 %v6024_v2 }
 0x7b8   : > { %v5411_v60 = vpop.eup %5410  ;;  %5434 = vtanh.f32 %v6034_v24 }
 0x7ba   : > { %v5413_v61 = vpop.eup %5412 }
 0x7bb   : > { %v5415_v62 = vpop.eup %5414  ;;  %5000 = vmatprep.subr.msk.mxu0 %vm406_vm0, %v5413_v61 }
 0x7bc   : > { %v5417_v3 = vpop.eup %5416  ;;  %5005 = vmatprep.subr.msk.mxu1 %vm406_vm0, %v5415_v62  ;;  %5001 = vmatpush1.msk.msra.mxu0 %vm406_vm0, %v5411_v60  ;;  %v2631_v62 = vld [vmem:[%s6691_s3] sm:$0xff] }
 0x7bd   : > { %v5419_v4 = vpop.eup %5418  ;;  %5006 = vmatpush1.msk.msra.mxu1 %vm406_vm0, %v5417_v3  ;;  %2223 = vmatprep.subr.mxu0 %v5409_v59 }
 0x7be   : > { %v5421_v5 = vpop.eup %5420  ;;  %2306 = vmatprep.subr.mxu1 %v5419_v4  ;;  %2224 = vmatpush1.msra.mxu0 %v5407_v57  ;;  %v2632_v4 = vld [vmem:[%s6691_s3 + $0x8] sm:$0xff] }
 0x7bf   : > { %v5423_v8 = vpop.eup %5422  ;;  %2307 = vmatpush1.msra.mxu1 %v5421_v5  ;;  %2225 = vmatprep.subr.mxu0 %v5405_v58  ;;  %v2633_v5 = vld [vmem:[%s6691_s3 + $0x10] sm:$0xf] }
 0x7c0   : > { %v5425_v10 = vpop.eup %5424  ;;  %2308 = vmatprep.subr.mxu1 %v5423_v8  ;;  %2226 = vmatpush1.msra.mxu0 %v5403_v56 }
 0x7c1   : > { %2309 = vmatpush1.msra.mxu1 %v5425_v10  ;;  %5002 = vmatmul.mubr.msk.f32.vlgmr.msra.gmra.mxu0 %vm396_vm1, %v4994_v7  ;;  %v5427_v46 = vpop.eup %5426 }
 0x7c2   : > { %5007 = vmatmul.mubr.msk.f32.vlgmr.msra.gmra.mxu1 %vm396_vm1, %v4994_v7  ;;  %2265 = vmatprep.mubr.f32.mxu0 %v5754_v35  ;;  %v5429_v47 = vpop.eup %5428  ;;  %v6329_v7 = vpop.permute.xlu0 %2644 }
 0x7c3   : > { %2348 = vmatprep.mubr.f32.mxu1 %v5754_v35  ;;  %v5431_v12 = vpop.eup %5430 }
 0x7c4   : > { %v5433_v48 = vpop.eup %5432 }
 0x7c5   : > { %5003 = vmatmul.mubr.msk.f32.gmra.mxu0 %vm396_vm1, %v4995_v11  ;;  %v5435_v49 = vpop.eup %5434 }
 0x7c6   : > { %5008 = vmatmul.mubr.msk.f32.gmra.mxu1 %vm396_vm1, %v4995_v11  ;;  %2271 = vmatprep.mubr.f32.mxu0 %v5754_v35  ;;  %v6331_v8 = vpop.permute.xlu0 %2869 }
 0x7c7   : > { %2354 = vmatprep.mubr.f32.mxu1 %v5754_v35 }
 0x7c9   : > { %5004 = vmatmul.mubr.msk.f32.gmra.mxu0 %vm396_vm1, %v4996_v15 }
 0x7ca   : > { %5009 = vmatmul.mubr.msk.f32.gmra.mxu1 %vm396_vm1, %v4996_v15  ;;  %2461 = vmatprep.mubr.f32.mxu0 %v5754_v35  ;;  %v6333_v10 = vpop.permute.xlu0 %2859 }
 0x7cb   : > { %2532 = vmatprep.mubr.f32.mxu1 %v5754_v35 }
 0x7ce   : > { %v6335_v11 = vpop.permute.xlu0 %3084 }
 0x7d2   : > { %v6337_v15 = vpop.permute.xlu0 %3309 }
 0x881   : > { %v2261_v17 = vpop.f32.mrf.mxu0 }
 0x882   : > { %v2344_v21 = vpop.f32.mrf.mxu1  ;;  %v2262_v27 = vadd.f32 %v2261_v17, %v2162_v23 }
 0x883   : > { %v2263_v22 = vpop.f32.mrf.mxu0  ;;  %v2345_v24 = vadd.f32 %v2344_v21, %v2162_v23 }
 0x884   : > { %v2346_v26 = vpop.f32.mrf.mxu1  ;;  %v2264_v33 = vadd.f32 %v2263_v22, %v2162_v23  ;;  %5436 = vtanh.f32 %v2262_v27 }
 0x885   : > { %v2267_v20 = vpop.f32.mrf.mxu0  ;;  %v2347_v45 = vadd.f32 %v2346_v26, %v2162_v23 }
 0x886   : > { %v2350_v13 = vpop.f32.mrf.mxu1  ;;  %v2268_v34 = vadd.f32 %v2267_v20, %v2167_v32  ;;  %5438 = vtanh.f32 %v2264_v33 }
 0x887   : > { %v2269_v36 = vpop.f32.mrf.mxu0  ;;  %v2351_v44 = vadd.f32 %v2350_v13, %v2167_v32 }
 0x888   : > { %v2270_v37 = vadd.f32 %v2269_v36, %v2167_v32  ;;  %v2352_v38 = vpop.f32.mrf.mxu1  ;;  %5440 = vtanh.f32 %v2268_v34 }
 0x889   : > { %v2273_v63 = vpop.f32.mrf.mxu0  ;;  %v2353_v43 = vadd.f32 %v2352_v38, %v2167_v32  ;;  %v5755_v32 = vmov 1966171168  }
 0x88a   : > { %v2274_v39 = vadd.f32 %v2273_v63, %v2172_v16  ;;  %v2356_v0 = vpop.f32.mrf.mxu1  ;;  %5442 = vtanh.f32 %v2270_v37  ;;  %v2546_v33 = vunpack.c.l.s4 %v5755_v32 }
 0x88b   : > { %v2275_v40 = vpop.f32.mrf.mxu0  ;;  %v2357_v1 = vadd.f32 %v2356_v0, %v2172_v16 }
 0x88c   : > { %v2276_v41 = vadd.f32 %v2275_v40, %v2172_v16  ;;  %v2358_v42 = vpop.f32.mrf.mxu1  ;;  %5444 = vtanh.f32 %v2274_v39  ;;  %v2547_v34 = vunpack.c.0.s8 %v2546_v33 }
 0x88d   : > { %v2359_v2 = vadd.f32 %v2358_v42, %v2172_v16  ;;  %v6339_v16 = vpop.permute.xlu0 %3299 }
 0x88e   : > { %5446 = vtanh.f32 %v2276_v41  ;;  %v6361_v40 = vsub.s32 %v2547_v34, %v5868_v9 }
 0x88f   : > { %5448 = vtanh.f32 %v2359_v2 }
 0x890   : > { %5450 = vtanh.f32 %v2357_v1 }
 0x891   : > { %5452 = vtanh.f32 %v2353_v43  ;;  %v5437_v14 = vpop.eup %5436  ;;  %v6341_v17 = vpop.permute.xlu0 %3524 }
 0x892   : > { %5454 = vtanh.f32 %v2351_v44  ;;  %v2650_v43 = vpop.permute.xlu1 %2649 }
 0x893   : > { %5456 = vtanh.f32 %v2347_v45  ;;  %v5439_v50 = vpop.eup %5438 }
 0x894   : > { %5458 = vtanh.f32 %v2345_v24 }
 0x895   : > { %5460 = vtanh.f32 %v6036_v25  ;;  %v5441_v51 = vpop.eup %5440  ;;  %v6343_v21 = vpop.permute.xlu0 %3749 }
 0x896   : > { %5462 = vtanh.f32 %v6040_v28 }
 0x897   : > { %5464 = vtanh.f32 %v6042_v29  ;;  %v5443_v52 = vpop.eup %5442 }
 0x898   : > { %5466 = vtanh.f32 %v6044_v30  ;;  %v285_v30 = vld [vmem:[%s6693_s5] sm:$0x1] }
 0x899   : > { %5468 = vtanh.f32 %v6046_v18  ;;  %v5445_v53 = vpop.eup %5444  ;;  %v6345_v22 = vpop.permute.xlu0 %3739 }
 0x89a   : > { %5470 = vtanh.f32 %v6050_v31 }
 0x89b   : > { %v5447_v55 = vpop.eup %5446  ;;  %5472 = vtanh.f32 %v6048_v19 }
 0x89c   : > { %v5449_v56 = vpop.eup %5448  ;;  %5010 = vmatprep.subr.msk.mxu0 %vm406_vm0, %v5447_v55 }
 0x89d   : > { %v5451_v25 = vpop.eup %5450  ;;  %5013 = vmatprep.subr.msk.mxu1 %vm406_vm0, %v5449_v56  ;;  %5011 = vmatpush1.msk.msra.mxu0 %vm406_vm0, %v5445_v53  ;;  %v6347_v23 = vpop.permute.xlu0 %3964 }
 0x89e   : > { %v5453_v28 = vpop.eup %5452  ;;  %5014 = vmatpush1.msk.msra.mxu1 %vm406_vm0, %v5451_v25  ;;  %2425 = vmatprep.subr.mxu0 %v5443_v52 }
 0x89f   : > { %v5455_v29 = vpop.eup %5454  ;;  %2496 = vmatprep.subr.mxu1 %v5453_v28  ;;  %2426 = vmatpush1.msra.mxu0 %v5441_v51 }
 0x8a0   : > { %v5457_v18 = vpop.eup %5456  ;;  %2497 = vmatpush1.msra.mxu1 %v5455_v29  ;;  %2427 = vmatprep.subr.mxu0 %v5439_v50 }
 0x8a1   : > { %v5459_v19 = vpop.eup %5458  ;;  %2498 = vmatprep.subr.mxu1 %v5457_v18  ;;  %2428 = vmatpush1.msra.mxu0 %v5437_v14  ;;  %v6349_v26 = vpop.permute.xlu0 %4189 }
 0x8a2   : > { %v5461_v31 = vpop.eup %5460  ;;  %2499 = vmatpush1.msra.mxu1 %v5459_v19  ;;  %5012 = vmatmul.mubr.msk.f32.vlgmr.msra.gmra.mxu0 %vm396_vm1, %v285_v30 }
 0x8a3   : > { %v5463_v58 = vpop.eup %5462  ;;  %5015 = vmatmul.mubr.msk.f32.vlgmr.msra.gmra.mxu1 %vm396_vm1, %v285_v30  ;;  %5016 = vmatprep.subr.msk.mxu0 %vm406_vm0, %v5429_v47 }
 0x8a4   : > { %v5465_v57 = vpop.eup %5464  ;;  %5021 = vmatprep.subr.msk.mxu1 %vm406_vm0, %v5433_v48  ;;  %5017 = vmatpush1.msk.msra.mxu0 %vm406_vm0, %v5427_v46 }
 0x8a5   : > { %v5467_v59 = vpop.eup %5466  ;;  %5022 = vmatpush1.msk.msra.mxu1 %vm406_vm0, %v5431_v12  ;;  %2701 = vmatprep.subr.mxu0 %v5461_v31  ;;  %v6351_v27 = vpop.permute.xlu0 %4179 }
 0x8a6   : > { %v5469_v60 = vpop.eup %5468  ;;  %2784 = vmatprep.subr.mxu1 %v5465_v57  ;;  %2702 = vmatpush1.msra.mxu0 %v5435_v49  ;;  %v2640_v12 = vpop.permute.xlu1 %2639 }
 0x8a7   : > { %v5471_v61 = vpop.eup %5470  ;;  %2785 = vmatpush1.msra.mxu1 %v5463_v58  ;;  %2703 = vmatprep.subr.mxu0 %v5469_v60 }
 0x8a8   : > { %v5473_v3 = vpop.eup %5472  ;;  %2786 = vmatprep.subr.mxu1 %v5471_v61  ;;  %2704 = vmatpush1.msra.mxu0 %v5467_v59 }
 0x8a9   : > { %2737 = vmatprep.mubr.f32.mxu0 %v5754_v35  ;;  %2787 = vmatpush1.msra.mxu1 %v5473_v3  ;;  %v6353_v20 = vpop.permute.xlu0 %4404 }
 0x8aa   : > { %2820 = vmatprep.mubr.f32.mxu1 %v5754_v35  ;;  %5018 = vmatmul.mubr.msk.f32.vlgmr.msra.gmra.mxu0 %vm396_vm1, %v2631_v62 }
 0x8ab   : > { %5023 = vmatmul.mubr.msk.f32.vlgmr.msra.gmra.mxu1 %vm396_vm1, %v2631_v62  ;;  %2743 = vmatprep.mubr.f32.mxu0 %v5754_v35 }
 0x8ac   : > { %2826 = vmatprep.mubr.f32.mxu1 %v5754_v35 }
 0x8ad   : > { %v2376_v13 = vpop.permute.xlu0 %2375 }
 0x8ae   : > { %5019 = vmatmul.mubr.msk.f32.gmra.mxu0 %vm396_vm1, %v2632_v4  ;;  %v6356_v37 = vrot.slane %v2376_v13, %v6011_v54 }
 0x8af   : > { %5024 = vmatmul.mubr.msk.f32.gmra.mxu1 %vm396_vm1, %v2632_v4  ;;  %2749 = vmatprep.mubr.f32.mxu0 %v5754_v35 }
 0x8b0   : > { %2832 = vmatprep.mubr.f32.mxu1 %v5754_v35 }
 0x8b2   : > { %5020 = vmatmul.mubr.msk.f32.gmra.mxu0 %vm396_vm1, %v2633_v5 }
 0x8b3   : > { %5025 = vmatmul.mubr.msk.f32.gmra.mxu1 %vm396_vm1, %v2633_v5  ;;  %2957 = vmatprep.mubr.f32.mxu0 %v5754_v35 }
 0x8b4   : > { %3040 = vmatprep.mubr.f32.mxu1 %v5754_v35 }
 0x962   : > { %v2463_v36 = vpop.f32.mrf.mxu0 }
 0x963   : > { %v2534_v38 = vpop.f32.mrf.mxu1  ;;  %v2464_v39 = vadd.f32 %v2463_v36, %v6356_v37 }
 0x964   : > { %v2465_v63 = vpop.f32.mrf.mxu0  ;;  %v2535_v41 = vadd.f32 %v2534_v38, %v6356_v37 }
 0x965   : > { %v2466_v0 = vadd.f32 %v2465_v63, %v6356_v37  ;;  %v2536_v1 = vpop.f32.mrf.mxu1  ;;  %v5026_v63 = vld [vmem:[%s6691_s3 + $0x18] sm:$0xff] }
 0x966   : > { %v2537_v42 = vadd.f32 %v2536_v1, %v6356_v37  ;;  %v5027_v1 = vld [vmem:[%s6691_s3 + $0x20] sm:$0xff] }
 0x967   : > { %v2543_v2 = vcombine.low %v2464_v39, %v2466_v0 }
 0x968   : > { %v2544_v54 = vcombine.low %v2535_v41, %v2537_v42  ;;  %v5028_v41 = vld [vmem:[%s6691_s3 + $0x28] sm:$0xf] }
 0x969   : > { %v2551_v44 = vrot.slane %v2543_v2, %v6361_v40 }
 0x96a   : > { %v2558_v45 = vrot.slane %v2544_v54, %v6361_v40  ;;  %v2739_v24 = vpop.f32.mrf.mxu0 }
 0x96b   : > { %v2822_v46 = vpop.f32.mrf.mxu1  ;;  %v2740_v50 = vadd.f32 %v2739_v24, %v2640_v12  ;;  %v2865_v24 = vpop.permute.xlu1 %2864 }
 0x96c   : > { %v2559_v47 = vcombine.low %v2551_v44, %v2558_v45  ;;  %v2741_v9 = vpop.f32.mrf.mxu0  ;;  %v2823_v62 = vadd.f32 %v2822_v46, %v2640_v12 }
 0x96d   : > { %v2824_v48 = vpop.f32.mrf.mxu1  ;;  %v2742_v52 = vadd.f32 %v2741_v9, %v2640_v12  ;;  %5474 = vtanh.f32 %v2740_v50 }
 0x96e   : > { %v2566_v14 = vrot.slane %v2559_v47, %v6361_v40  ;;  %v2745_v51 = vpop.f32.mrf.mxu0  ;;  %v2825_v61 = vadd.f32 %v2824_v48, %v2640_v12 }
 0x96f   : > { %v2828_v53 = vpop.f32.mrf.mxu1  ;;  %v2746_v55 = vadd.f32 %v2745_v51, %v6329_v7  ;;  %5476 = vtanh.f32 %v2742_v52 }
 0x970   : > { %v2747_v56 = vpop.f32.mrf.mxu0  ;;  %2572 = vst.msk [vmem:[%s6377_s21] sm:$0xf] %vm6371_vm2, %v2566_v14  ;;  %v2829_v60 = vadd.f32 %v2828_v53, %v6329_v7 }
 0x971   : > { %v2748_v6 = vadd.f32 %v2747_v56, %v6329_v7  ;;  %v2830_v25 = vpop.f32.mrf.mxu1  ;;  %5478 = vtanh.f32 %v2746_v55 }
 0x972   : > { %v2751_v28 = vpop.f32.mrf.mxu0  ;;  %v2831_v57 = vadd.f32 %v2830_v25, %v6329_v7 }
 0x973   : > { %v2752_v29 = vadd.f32 %v2751_v28, %v2650_v43  ;;  %v2834_v30 = vpop.f32.mrf.mxu1  ;;  %5480 = vtanh.f32 %v2748_v6 }
 0x974   : > { %v2753_v18 = vpop.f32.mrf.mxu0  ;;  %v2835_v19 = vadd.f32 %v2834_v30, %v2650_v43 }
 0x975   : > { %v2754_v31 = vadd.f32 %v2753_v18, %v2650_v43  ;;  %v2836_v58 = vpop.f32.mrf.mxu1  ;;  %5482 = vtanh.f32 %v2752_v29 }
 0x976   : > { %v2837_v59 = vadd.f32 %v2836_v58, %v2650_v43 }
 0x977   : > { %5484 = vtanh.f32 %v2754_v31 }
 0x978   : > { %5486 = vtanh.f32 %v2837_v59 }
 0x979   : > { %5488 = vtanh.f32 %v2835_v19 }
 0x97a   : > { %5490 = vtanh.f32 %v2831_v57  ;;  %v5475_v3 = vpop.eup %5474 }
 0x97b   : > { %5492 = vtanh.f32 %v2829_v60 }
 0x97c   : > { %5494 = vtanh.f32 %v2825_v61  ;;  %v5477_v4 = vpop.eup %5476 }
 0x97d   : > { %5496 = vtanh.f32 %v2823_v62 }
 0x97e   : > { %v5479_v5 = vpop.eup %5478 }
 0x980   : > { %v5481_v32 = vpop.eup %5480 }
 0x982   : > { %v5483_v33 = vpop.eup %5482 }
 0x984   : > { %v5485_v13 = vpop.eup %5484 }
 0x985   : > { %v5487_v34 = vpop.eup %5486  ;;  %5032 = vmatprep.subr.msk.mxu0 %vm406_vm0, %v5485_v13  ;;  %v3090_v13 = vpop.permute.xlu1 %3089 }
 0x986   : > { %v5489_v36 = vpop.eup %5488  ;;  %5037 = vmatprep.subr.msk.mxu1 %vm406_vm0, %v5487_v34  ;;  %5033 = vmatpush1.msk.msra.mxu0 %vm406_vm0, %v5483_v33  ;;  %v5044_v33 = vld [vmem:[%s6691_s3 + $0x40] sm:$0xf] }
 0x987   : > { %v5491_v7 = vpop.eup %5490  ;;  %5038 = vmatpush1.msk.msra.mxu1 %vm406_vm0, %v5489_v36  ;;  %2921 = vmatprep.subr.mxu0 %v5481_v32  ;;  %v5043_v32 = vld [vmem:[%s6691_s3 + $0x38] sm:$0xff] }
 0x988   : > { %v5493_v38 = vpop.eup %5492  ;;  %3004 = vmatprep.subr.mxu1 %v5491_v7  ;;  %2922 = vmatpush1.msra.mxu0 %v5479_v5 }
 0x989   : > { %v5495_v39 = vpop.eup %5494  ;;  %3005 = vmatpush1.msra.mxu1 %v5493_v38  ;;  %2923 = vmatprep.subr.mxu0 %v5477_v4  ;;  %v3080_v38 = vpop.permute.xlu1 %3079 }
 0x98a   : > { %v5497_v0 = vpop.eup %5496  ;;  %3006 = vmatprep.subr.mxu1 %v5495_v39  ;;  %2924 = vmatpush1.msra.mxu0 %v5475_v3  ;;  %v5042_v3 = vld [vmem:[%s6691_s3 + $0x30] sm:$0xff] }
 0x98b   : > { %3007 = vmatpush1.msra.mxu1 %v5497_v0  ;;  %5034 = vmatmul.mubr.msk.f32.vlgmr.msra.gmra.mxu0 %vm396_vm1, %v5026_v63 }
 0x98c   : > { %5039 = vmatmul.mubr.msk.f32.vlgmr.msra.gmra.mxu1 %vm396_vm1, %v5026_v63  ;;  %2963 = vmatprep.mubr.f32.mxu0 %v5754_v35 }
 0x98d   : > { %3046 = vmatprep.mubr.f32.mxu1 %v5754_v35 }
 0x98f   : > { %5035 = vmatmul.mubr.msk.f32.gmra.mxu0 %vm396_vm1, %v5027_v1 }
 0x990   : > { %5040 = vmatmul.mubr.msk.f32.gmra.mxu1 %vm396_vm1, %v5027_v1  ;;  %2969 = vmatprep.mubr.f32.mxu0 %v5754_v35 }
 0x991   : > { %3052 = vmatprep.mubr.f32.mxu1 %v5754_v35 }
 0x993   : > { %5036 = vmatmul.mubr.msk.f32.gmra.mxu0 %vm396_vm1, %v5028_v41 }
 0x994   : > { %5041 = vmatmul.mubr.msk.f32.gmra.mxu1 %vm396_vm1, %v5028_v41  ;;  %3177 = vmatprep.mubr.f32.mxu0 %v5754_v35 }
 0x995   : > { %3260 = vmatprep.mubr.f32.mxu1 %v5754_v35 }
 0xa4b   : > { %v2959_v42 = vpop.f32.mrf.mxu0 }
 0xa4c   : > { %v3042_v43 = vpop.f32.mrf.mxu1  ;;  %v2960_v44 = vadd.f32 %v2959_v42, %v6333_v10 }
 0xa4d   : > { %v2961_v2 = vpop.f32.mrf.mxu0  ;;  %v3043_v18 = vadd.f32 %v3042_v43, %v6333_v10 }
 0xa4e   : > { %v3044_v54 = vpop.f32.mrf.mxu1  ;;  %v2962_v46 = vadd.f32 %v2961_v2, %v6333_v10  ;;  %5498 = vtanh.f32 %v2960_v44 }
 0xa4f   : > { %v2965_v45 = vpop.f32.mrf.mxu0  ;;  %v3045_v30 = vadd.f32 %v3044_v54, %v6333_v10 }
 0xa50   : > { %v3048_v47 = vpop.f32.mrf.mxu1  ;;  %v2966_v9 = vadd.f32 %v2965_v45, %v2865_v24  ;;  %5500 = vtanh.f32 %v2962_v46 }
 0xa51   : > { %v2967_v12 = vpop.f32.mrf.mxu0  ;;  %v3049_v29 = vadd.f32 %v3048_v47, %v2865_v24 }
 0xa52   : > { %v2968_v48 = vadd.f32 %v2967_v12, %v2865_v24  ;;  %v3050_v14 = vpop.f32.mrf.mxu1  ;;  %5502 = vtanh.f32 %v2966_v9 }
 0xa53   : > { %v2971_v50 = vpop.f32.mrf.mxu0  ;;  %v3051_v25 = vadd.f32 %v3050_v14, %v2865_v24 }
 0xa54   : > { %v2972_v51 = vadd.f32 %v2971_v50, %v6331_v8  ;;  %v3054_v52 = vpop.f32.mrf.mxu1  ;;  %5504 = vtanh.f32 %v2968_v48 }
 0xa55   : > { %v2973_v53 = vpop.f32.mrf.mxu0  ;;  %v3055_v55 = vadd.f32 %v3054_v52, %v6331_v8 }
 0xa56   : > { %v2974_v56 = vadd.f32 %v2973_v53, %v6331_v8  ;;  %v3056_v6 = vpop.f32.mrf.mxu1  ;;  %5506 = vtanh.f32 %v2972_v51 }
 0xa57   : > { %v3057_v28 = vadd.f32 %v3056_v6, %v6331_v8 }
 0xa58   : > { %5508 = vtanh.f32 %v2974_v56 }
 0xa59   : > { %5510 = vtanh.f32 %v3057_v28 }
 0xa5a   : > { %5512 = vtanh.f32 %v3055_v55 }
 0xa5b   : > { %5514 = vtanh.f32 %v3051_v25  ;;  %v5499_v19 = vpop.eup %5498 }
 0xa5c   : > { %5516 = vtanh.f32 %v3049_v29 }
 0xa5d   : > { %5518 = vtanh.f32 %v3045_v30  ;;  %v5501_v31 = vpop.eup %5500 }
 0xa5e   : > { %5520 = vtanh.f32 %v3043_v18 }
 0xa5f   : > { %v5503_v58 = vpop.eup %5502 }
 0xa61   : > { %v5505_v57 = vpop.eup %5504 }
 0xa63   : > { %v5507_v59 = vpop.eup %5506 }
 0xa65   : > { %v5509_v60 = vpop.eup %5508 }
 0xa66   : > { %v5511_v61 = vpop.eup %5510  ;;  %5048 = vmatprep.subr.msk.mxu0 %vm406_vm0, %v5509_v60 }
 0xa67   : > { %v5513_v8 = vpop.eup %5512  ;;  %5053 = vmatprep.subr.msk.mxu1 %vm406_vm0, %v5511_v61  ;;  %5049 = vmatpush1.msk.msra.mxu0 %vm406_vm0, %v5507_v59  ;;  %v5060_v59 = vld [vmem:[%s6691_s3 + $0x58] sm:$0xf] }
 0xa68   : > { %v5515_v10 = vpop.eup %5514  ;;  %5054 = vmatpush1.msk.msra.mxu1 %vm406_vm0, %v5513_v8  ;;  %3141 = vmatprep.subr.mxu0 %v5505_v57  ;;  %v5059_v57 = vld [vmem:[%s6691_s3 + $0x50] sm:$0xff] }
 0xa69   : > { %v5517_v62 = vpop.eup %5516  ;;  %3224 = vmatprep.subr.mxu1 %v5515_v10  ;;  %3142 = vmatpush1.msra.mxu0 %v5503_v58 }
 0xa6a   : > { %v5519_v4 = vpop.eup %5518  ;;  %3225 = vmatpush1.msra.mxu1 %v5517_v62  ;;  %3143 = vmatprep.subr.mxu0 %v5501_v31 }
 0xa6b   : > { %v5521_v5 = vpop.eup %5520  ;;  %3226 = vmatprep.subr.mxu1 %v5519_v4  ;;  %3144 = vmatpush1.msra.mxu0 %v5499_v19  ;;  %v5058_v19 = vld [vmem:[%s6691_s3 + $0x48] sm:$0xff]  ;;  %v3305_v4 = vpop.permute.xlu1 %3304 }
 0xa6c   : > { %3227 = vmatpush1.msra.mxu1 %v5521_v5  ;;  %5050 = vmatmul.mubr.msk.f32.vlgmr.msra.gmra.mxu0 %vm396_vm1, %v5042_v3 }
 0xa6d   : > { %5055 = vmatmul.mubr.msk.f32.vlgmr.msra.gmra.mxu1 %vm396_vm1, %v5042_v3  ;;  %3183 = vmatprep.mubr.f32.mxu0 %v5754_v35 }
 0xa6e   : > { %3266 = vmatprep.mubr.f32.mxu1 %v5754_v35 }
 0xa70   : > { %5051 = vmatmul.mubr.msk.f32.gmra.mxu0 %vm396_vm1, %v5043_v32 }
 0xa71   : > { %5056 = vmatmul.mubr.msk.f32.gmra.mxu1 %vm396_vm1, %v5043_v32  ;;  %3189 = vmatprep.mubr.f32.mxu0 %v5754_v35 }
 0xa72   : > { %3272 = vmatprep.mubr.f32.mxu1 %v5754_v35 }
 0xa74   : > { %5052 = vmatmul.mubr.msk.f32.gmra.mxu0 %vm396_vm1, %v5044_v33 }
 0xa75   : > { %5057 = vmatmul.mubr.msk.f32.gmra.mxu1 %vm396_vm1, %v5044_v33  ;;  %3397 = vmatprep.mubr.f32.mxu0 %v5754_v35 }
 0xa76   : > { %3480 = vmatprep.mubr.f32.mxu1 %v5754_v35 }
 0xb2c   : > { %v3179_v34 = vpop.f32.mrf.mxu0 }
 0xb2d   : > { %v3262_v36 = vpop.f32.mrf.mxu1  ;;  %v3180_v39 = vadd.f32 %v3179_v34, %v3080_v38 }
 0xb2e   : > { %v3181_v7 = vpop.f32.mrf.mxu0  ;;  %v3263_v52 = vadd.f32 %v3262_v36, %v3080_v38 }
 0xb2f   : > { %v3264_v63 = vpop.f32.mrf.mxu1  ;;  %v3182_v1 = vadd.f32 %v3181_v7, %v3080_v38  ;;  %5522 = vtanh.f32 %v3180_v39 }
 0xb30   : > { %v3185_v0 = vpop.f32.mrf.mxu0  ;;  %v3265_v51 = vadd.f32 %v3264_v63, %v3080_v38 }
 0xb31   : > { %v3268_v41 = vpop.f32.mrf.mxu1  ;;  %v3186_v42 = vadd.f32 %v3185_v0, %v6335_v11  ;;  %5524 = vtanh.f32 %v3182_v1 }
 0xb32   : > { %v3187_v43 = vpop.f32.mrf.mxu0  ;;  %v3269_v50 = vadd.f32 %v3268_v41, %v6335_v11 }
 0xb33   : > { %v3188_v2 = vadd.f32 %v3187_v43, %v6335_v11  ;;  %v3270_v54 = vpop.f32.mrf.mxu1  ;;  %5526 = vtanh.f32 %v3186_v42 }
 0xb34   : > { %v3191_v44 = vpop.f32.mrf.mxu0  ;;  %v3271_v48 = vadd.f32 %v3270_v54, %v6335_v11 }
 0xb35   : > { %v3192_v45 = vadd.f32 %v3191_v44, %v3090_v13  ;;  %v3274_v24 = vpop.f32.mrf.mxu1  ;;  %5528 = vtanh.f32 %v3188_v2 }
 0xb36   : > { %v3193_v46 = vpop.f32.mrf.mxu0  ;;  %v3275_v47 = vadd.f32 %v3274_v24, %v3090_v13 }
 0xb37   : > { %v3194_v9 = vadd.f32 %v3193_v46, %v3090_v13  ;;  %v3276_v12 = vpop.f32.mrf.mxu1  ;;  %5530 = vtanh.f32 %v3192_v45 }
 0xb38   : > { %v3277_v14 = vadd.f32 %v3276_v12, %v3090_v13 }
 0xb39   : > { %5532 = vtanh.f32 %v3194_v9 }
 0xb3a   : > { %5534 = vtanh.f32 %v3277_v14 }
 0xb3b   : > { %5536 = vtanh.f32 %v3275_v47 }
 0xb3c   : > { %5538 = vtanh.f32 %v3271_v48  ;;  %v5523_v53 = vpop.eup %5522 }
 0xb3d   : > { %5540 = vtanh.f32 %v3269_v50  ;;  %v5074_v50 = vld [vmem:[%s6691_s3 + $0x60] sm:$0xff] }
 0xb3e   : > { %5542 = vtanh.f32 %v3265_v51  ;;  %v5525_v55 = vpop.eup %5524 }
 0xb3f   : > { %5544 = vtanh.f32 %v3263_v52 }
 0xb40   : > { %v5527_v56 = vpop.eup %5526 }
 0xb42   : > { %v5529_v6 = vpop.eup %5528 }
 0xb44   : > { %v5531_v25 = vpop.eup %5530 }
 0xb46   : > { %v5533_v28 = vpop.eup %5532 }
 0xb47   : > { %v5535_v29 = vpop.eup %5534  ;;  %5064 = vmatprep.subr.msk.mxu0 %vm406_vm0, %v5533_v28 }
 0xb48   : > { %v5537_v30 = vpop.eup %5536  ;;  %5069 = vmatprep.subr.msk.mxu1 %vm406_vm0, %v5535_v29  ;;  %5065 = vmatpush1.msk.msra.mxu0 %vm406_vm0, %v5531_v25 }
 0xb49   : > { %v5539_v11 = vpop.eup %5538  ;;  %5070 = vmatpush1.msk.msra.mxu1 %vm406_vm0, %v5537_v30  ;;  %3361 = vmatprep.subr.mxu0 %v5529_v6 }
 0xb4a   : > { %v5541_v18 = vpop.eup %5540  ;;  %3444 = vmatprep.subr.mxu1 %v5539_v11  ;;  %3362 = vmatpush1.msra.mxu0 %v5527_v56  ;;  %v3530_v56 = vpop.permute.xlu1 %3529 }
 0xb4b   : > { %v5543_v31 = vpop.eup %5542  ;;  %3445 = vmatpush1.msra.mxu1 %v5541_v18  ;;  %3363 = vmatprep.subr.mxu0 %v5525_v55  ;;  %v5076_v55 = vld [vmem:[%s6691_s3 + $0x70] sm:$0xf] }
 0xb4c   : > { %v5545_v58 = vpop.eup %5544  ;;  %3446 = vmatprep.subr.mxu1 %v5543_v31  ;;  %3364 = vmatpush1.msra.mxu0 %v5523_v53  ;;  %v5075_v53 = vld [vmem:[%s6691_s3 + $0x68] sm:$0xff] }
 0xb4d   : > { %3447 = vmatpush1.msra.mxu1 %v5545_v58  ;;  %5066 = vmatmul.mubr.msk.f32.vlgmr.msra.gmra.mxu0 %vm396_vm1, %v5058_v19 }
 0xb4e   : > { %5071 = vmatmul.mubr.msk.f32.vlgmr.msra.gmra.mxu1 %vm396_vm1, %v5058_v19  ;;  %3403 = vmatprep.mubr.f32.mxu0 %v5754_v35  ;;  %v3520_v29 = vpop.permute.xlu1 %3519 }
 0xb4f   : > { %3486 = vmatprep.mubr.f32.mxu1 %v5754_v35 }
 0xb51   : > { %5067 = vmatmul.mubr.msk.f32.gmra.mxu0 %vm396_vm1, %v5059_v57 }
 0xb52   : > { %5072 = vmatmul.mubr.msk.f32.gmra.mxu1 %vm396_vm1, %v5059_v57  ;;  %3409 = vmatprep.mubr.f32.mxu0 %v5754_v35 }
 0xb53   : > { %3492 = vmatprep.mubr.f32.mxu1 %v5754_v35 }
 0xb55   : > { %5068 = vmatmul.mubr.msk.f32.gmra.mxu0 %vm396_vm1, %v5060_v59 }
 0xb56   : > { %5073 = vmatmul.mubr.msk.f32.gmra.mxu1 %vm396_vm1, %v5060_v59  ;;  %3617 = vmatprep.mubr.f32.mxu0 %v5754_v35 }
 0xb57   : > { %3700 = vmatprep.mubr.f32.mxu1 %v5754_v35 }
 0xc0d   : > { %v3399_v60 = vpop.f32.mrf.mxu0 }
 0xc0e   : > { %v3482_v61 = vpop.f32.mrf.mxu1  ;;  %v3400_v62 = vadd.f32 %v3399_v60, %v6339_v16 }
 0xc0f   : > { %v3401_v8 = vpop.f32.mrf.mxu0  ;;  %v3483_v44 = vadd.f32 %v3482_v61, %v6339_v16 }
 0xc10   : > { %v3484_v10 = vpop.f32.mrf.mxu1  ;;  %v3402_v5 = vadd.f32 %v3401_v8, %v6339_v16  ;;  %5546 = vtanh.f32 %v3400_v62 }
 0xc11   : > { %v3405_v3 = vpop.f32.mrf.mxu0  ;;  %v3485_v54 = vadd.f32 %v3484_v10, %v6339_v16 }
 0xc12   : > { %v3488_v32 = vpop.f32.mrf.mxu1  ;;  %v3406_v33 = vadd.f32 %v3405_v3, %v3305_v4  ;;  %5548 = vtanh.f32 %v3402_v5 }
 0xc13   : > { %v3407_v13 = vpop.f32.mrf.mxu0  ;;  %v3489_v2 = vadd.f32 %v3488_v32, %v3305_v4 }
 0xc14   : > { %v3408_v34 = vadd.f32 %v3407_v13, %v3305_v4  ;;  %v3490_v36 = vpop.f32.mrf.mxu1  ;;  %5550 = vtanh.f32 %v3406_v33 }
 0xc15   : > { %v3411_v7 = vpop.f32.mrf.mxu0  ;;  %v3491_v42 = vadd.f32 %v3490_v36, %v3305_v4 }
 0xc16   : > { %v3412_v38 = vadd.f32 %v3411_v7, %v6337_v15  ;;  %v3494_v63 = vpop.f32.mrf.mxu1  ;;  %5552 = vtanh.f32 %v3408_v34 }
 0xc17   : > { %v3413_v39 = vpop.f32.mrf.mxu0  ;;  %v3495_v0 = vadd.f32 %v3494_v63, %v6337_v15 }
 0xc18   : > { %v3414_v1 = vadd.f32 %v3413_v39, %v6337_v15  ;;  %v3496_v41 = vpop.f32.mrf.mxu1  ;;  %5554 = vtanh.f32 %v3412_v38 }
 0xc19   : > { %v3497_v43 = vadd.f32 %v3496_v41, %v6337_v15 }
 0xc1a   : > { %5556 = vtanh.f32 %v3414_v1 }
 0xc1b   : > { %5558 = vtanh.f32 %v3497_v43 }
 0xc1c   : > { %5560 = vtanh.f32 %v3495_v0 }
 0xc1d   : > { %5562 = vtanh.f32 %v3491_v42  ;;  %v5547_v45 = vpop.eup %5546 }
 0xc1e   : > { %5564 = vtanh.f32 %v3489_v2  ;;  %v5090_v2 = vld [vmem:[%s6691_s3 + $0x78] sm:$0xff] }
 0xc1f   : > { %5566 = vtanh.f32 %v3485_v54  ;;  %v5549_v24 = vpop.eup %5548 }
 0xc20   : > { %5568 = vtanh.f32 %v3483_v44 }
 0xc21   : > { %v5551_v46 = vpop.eup %5550 }
 0xc23   : > { %v5553_v47 = vpop.eup %5552 }
 0xc25   : > { %v5555_v9 = vpop.eup %5554 }
 0xc27   : > { %v5557_v12 = vpop.eup %5556 }
 0xc28   : > { %v5559_v48 = vpop.eup %5558  ;;  %5080 = vmatprep.subr.msk.mxu0 %vm406_vm0, %v5557_v12 }
 0xc29   : > { %v5561_v15 = vpop.eup %5560  ;;  %5085 = vmatprep.subr.msk.mxu1 %vm406_vm0, %v5559_v48  ;;  %5081 = vmatpush1.msk.msra.mxu0 %vm406_vm0, %v5555_v9 }
 0xc2a   : > { %v5563_v16 = vpop.eup %5562  ;;  %5086 = vmatpush1.msk.msra.mxu1 %vm406_vm0, %v5561_v15  ;;  %3581 = vmatprep.subr.mxu0 %v5553_v47 }
 0xc2b   : > { %v5565_v14 = vpop.eup %5564  ;;  %3664 = vmatprep.subr.mxu1 %v5563_v16  ;;  %3582 = vmatpush1.msra.mxu0 %v5551_v46  ;;  %v3745_v16 = vpop.permute.xlu1 %3744 }
 0xc2c   : > { %v5567_v51 = vpop.eup %5566  ;;  %3665 = vmatpush1.msra.mxu1 %v5565_v14  ;;  %3583 = vmatprep.subr.mxu0 %v5549_v24  ;;  %v5092_v24 = vld [vmem:[%s6691_s3 + $0x88] sm:$0xf] }
 0xc2d   : > { %v5569_v52 = vpop.eup %5568  ;;  %3666 = vmatprep.subr.mxu1 %v5567_v51  ;;  %3584 = vmatpush1.msra.mxu0 %v5547_v45  ;;  %v5091_v45 = vld [vmem:[%s6691_s3 + $0x80] sm:$0xff] }
 0xc2e   : > { %3667 = vmatpush1.msra.mxu1 %v5569_v52  ;;  %5082 = vmatmul.mubr.msk.f32.vlgmr.msra.gmra.mxu0 %vm396_vm1, %v5074_v50 }
 0xc2f   : > { %5087 = vmatmul.mubr.msk.f32.vlgmr.msra.gmra.mxu1 %vm396_vm1, %v5074_v50  ;;  %3623 = vmatprep.mubr.f32.mxu0 %v5754_v35 }
 0xc30   : > { %3706 = vmatprep.mubr.f32.mxu1 %v5754_v35 }
 0xc32   : > { %5083 = vmatmul.mubr.msk.f32.gmra.mxu0 %vm396_vm1, %v5075_v53 }
 0xc33   : > { %5088 = vmatmul.mubr.msk.f32.gmra.mxu1 %vm396_vm1, %v5075_v53  ;;  %3629 = vmatprep.mubr.f32.mxu0 %v5754_v35 }
 0xc34   : > { %3712 = vmatprep.mubr.f32.mxu1 %v5754_v35 }
 0xc36   : > { %5084 = vmatmul.mubr.msk.f32.gmra.mxu0 %vm396_vm1, %v5076_v55 }
 0xc37   : > { %5089 = vmatmul.mubr.msk.f32.gmra.mxu1 %vm396_vm1, %v5076_v55  ;;  %3837 = vmatprep.mubr.f32.mxu0 %v5754_v35 }
 0xc38   : > { %3920 = vmatprep.mubr.f32.mxu1 %v5754_v35 }
 0xcee   : > { %v3619_v6 = vpop.f32.mrf.mxu0 }
 0xcef   : > { %v3702_v25 = vpop.f32.mrf.mxu1  ;;  %v3620_v11 = vadd.f32 %v3619_v6, %v3520_v29 }
 0xcf0   : > { %v3621_v28 = vpop.f32.mrf.mxu0  ;;  %v3703_v36 = vadd.f32 %v3702_v25, %v3520_v29 }
 0xcf1   : > { %v3704_v30 = vpop.f32.mrf.mxu1  ;;  %v3622_v19 = vadd.f32 %v3621_v28, %v3520_v29  ;;  %5570 = vtanh.f32 %v3620_v11 }
 0xcf2   : > { %v3625_v18 = vpop.f32.mrf.mxu0  ;;  %v3705_v34 = vadd.f32 %v3704_v30, %v3520_v29 }
 0xcf3   : > { %v3708_v31 = vpop.f32.mrf.mxu1  ;;  %v3626_v58 = vadd.f32 %v3625_v18, %v6341_v17  ;;  %5572 = vtanh.f32 %v3622_v19 }
 0xcf4   : > { %v3627_v57 = vpop.f32.mrf.mxu0  ;;  %v3709_v13 = vadd.f32 %v3708_v31, %v6341_v17 }
 0xcf5   : > { %v3628_v59 = vadd.f32 %v3627_v57, %v6341_v17  ;;  %v3710_v60 = vpop.f32.mrf.mxu1  ;;  %5574 = vtanh.f32 %v3626_v58 }
 0xcf6   : > { %v3631_v61 = vpop.f32.mrf.mxu0  ;;  %v3711_v32 = vadd.f32 %v3710_v60, %v6341_v17 }
 0xcf7   : > { %v3632_v8 = vadd.f32 %v3631_v61, %v3530_v56  ;;  %v3714_v10 = vpop.f32.mrf.mxu1  ;;  %5576 = vtanh.f32 %v3628_v59 }
 0xcf8   : > { %v3633_v62 = vpop.f32.mrf.mxu0  ;;  %v3715_v3 = vadd.f32 %v3714_v10, %v3530_v56 }
 0xcf9   : > { %v3634_v4 = vadd.f32 %v3633_v62, %v3530_v56  ;;  %v3716_v5 = vpop.f32.mrf.mxu1  ;;  %5578 = vtanh.f32 %v3632_v8 }
 0xcfa   : > { %v3717_v33 = vadd.f32 %v3716_v5, %v3530_v56  ;;  %v5106_v5 = vld [vmem:[%s6691_s3 + $0x90] sm:$0xff] }
 0xcfb   : > { %5580 = vtanh.f32 %v3634_v4 }
 0xcfc   : > { %5582 = vtanh.f32 %v3717_v33 }
 0xcfd   : > { %5584 = vtanh.f32 %v3715_v3 }
 0xcfe   : > { %5586 = vtanh.f32 %v3711_v32  ;;  %v5571_v7 = vpop.eup %5570 }
 0xcff   : > { %5588 = vtanh.f32 %v3709_v13  ;;  %v5107_v13 = vld [vmem:[%s6691_s3 + $0x98] sm:$0xff] }
 0xd00   : > { %5590 = vtanh.f32 %v3705_v34  ;;  %v5573_v38 = vpop.eup %5572  ;;  %v5108_v34 = vld [vmem:[%s6691_s3 + $0xa0] sm:$0xf] }
 0xd01   : > { %5592 = vtanh.f32 %v3703_v36  ;;  %v3970_v36 = vpop.permute.xlu1 %3969 }
 0xd02   : > { %v5575_v63 = vpop.eup %5574 }
 0xd04   : > { %v5577_v39 = vpop.eup %5576 }
 0xd06   : > { %v5579_v0 = vpop.eup %5578 }
 0xd08   : > { %v5581_v1 = vpop.eup %5580 }
 0xd09   : > { %v5583_v41 = vpop.eup %5582  ;;  %5096 = vmatprep.subr.msk.mxu0 %vm406_vm0, %v5581_v1 }
 0xd0a   : > { %v5585_v42 = vpop.eup %5584  ;;  %5101 = vmatprep.subr.msk.mxu1 %vm406_vm0, %v5583_v41  ;;  %5097 = vmatpush1.msk.msra.mxu0 %vm406_vm0, %v5579_v0 }
 0xd0b   : > { %v5587_v17 = vpop.eup %5586  ;;  %5102 = vmatpush1.msk.msra.mxu1 %vm406_vm0, %v5585_v42  ;;  %3801 = vmatprep.subr.mxu0 %v5577_v39  ;;  %v3960_v39 = vpop.permute.xlu1 %3959 }
 0xd0c   : > { %v5589_v43 = vpop.eup %5588  ;;  %3884 = vmatprep.subr.mxu1 %v5587_v17  ;;  %3802 = vmatpush1.msra.mxu0 %v5575_v63 }
 0xd0d   : > { %v5591_v54 = vpop.eup %5590  ;;  %3885 = vmatpush1.msra.mxu1 %v5589_v43  ;;  %3803 = vmatprep.subr.mxu0 %v5573_v38 }
 0xd0e   : > { %v5593_v44 = vpop.eup %5592  ;;  %3886 = vmatprep.subr.mxu1 %v5591_v54  ;;  %3804 = vmatpush1.msra.mxu0 %v5571_v7 }
 0xd0f   : > { %3887 = vmatpush1.msra.mxu1 %v5593_v44  ;;  %5098 = vmatmul.mubr.msk.f32.vlgmr.msra.gmra.mxu0 %vm396_vm1, %v5090_v2 }
 0xd10   : > { %5103 = vmatmul.mubr.msk.f32.vlgmr.msra.gmra.mxu1 %vm396_vm1, %v5090_v2  ;;  %3843 = vmatprep.mubr.f32.mxu0 %v5754_v35 }
 0xd11   : > { %3926 = vmatprep.mubr.f32.mxu1 %v5754_v35 }
 0xd13   : > { %5099 = vmatmul.mubr.msk.f32.gmra.mxu0 %vm396_vm1, %v5091_v45 }
 0xd14   : > { %5104 = vmatmul.mubr.msk.f32.gmra.mxu1 %vm396_vm1, %v5091_v45  ;;  %3849 = vmatprep.mubr.f32.mxu0 %v5754_v35 }
 0xd15   : > { %3932 = vmatprep.mubr.f32.mxu1 %v5754_v35 }
 0xd17   : > { %5100 = vmatmul.mubr.msk.f32.gmra.mxu0 %vm396_vm1, %v5092_v24 }
 0xd18   : > { %5105 = vmatmul.mubr.msk.f32.gmra.mxu1 %vm396_vm1, %v5092_v24  ;;  %4057 = vmatprep.mubr.f32.mxu0 %v5754_v35 }
 0xd19   : > { %4140 = vmatprep.mubr.f32.mxu1 %v5754_v35 }
 0xdcf   : > { %v3839_v46 = vpop.f32.mrf.mxu0 }
 0xdd0   : > { %v3922_v47 = vpop.f32.mrf.mxu1  ;;  %v3840_v48 = vadd.f32 %v3839_v46, %v6345_v22 }
 0xdd1   : > { %v3841_v9 = vpop.f32.mrf.mxu0  ;;  %v3923_v57 = vadd.f32 %v3922_v47, %v6345_v22 }
 0xdd2   : > { %v3924_v12 = vpop.f32.mrf.mxu1  ;;  %v3842_v14 = vadd.f32 %v3841_v9, %v6345_v22  ;;  %5594 = vtanh.f32 %v3840_v48 }
 0xdd3   : > { %v3845_v15 = vpop.f32.mrf.mxu0  ;;  %v3925_v58 = vadd.f32 %v3924_v12, %v6345_v22 }
 0xdd4   : > { %v3928_v50 = vpop.f32.mrf.mxu1  ;;  %v3846_v51 = vadd.f32 %v3845_v15, %v3745_v16  ;;  %5596 = vtanh.f32 %v3842_v14 }
 0xdd5   : > { %v3847_v52 = vpop.f32.mrf.mxu0  ;;  %v3929_v31 = vadd.f32 %v3928_v50, %v3745_v16 }
 0xdd6   : > { %v3848_v53 = vadd.f32 %v3847_v52, %v3745_v16  ;;  %v3930_v55 = vpop.f32.mrf.mxu1  ;;  %5598 = vtanh.f32 %v3846_v51 }
 0xdd7   : > { %v3851_v56 = vpop.f32.mrf.mxu0  ;;  %v3931_v18 = vadd.f32 %v3930_v55, %v3745_v16 }
 0xdd8   : > { %v3852_v6 = vadd.f32 %v3851_v56, %v6343_v21  ;;  %v3934_v25 = vpop.f32.mrf.mxu1  ;;  %5600 = vtanh.f32 %v3848_v53 }
 0xdd9   : > { %v3853_v28 = vpop.f32.mrf.mxu0  ;;  %v3935_v29 = vadd.f32 %v3934_v25, %v6343_v21 }
 0xdda   : > { %v3854_v30 = vadd.f32 %v3853_v28, %v6343_v21  ;;  %v3936_v11 = vpop.f32.mrf.mxu1  ;;  %5602 = vtanh.f32 %v3852_v6 }
 0xddb   : > { %v3937_v19 = vadd.f32 %v3936_v11, %v6343_v21  ;;  %v5122_v11 = vld [vmem:[%s6691_s3 + $0xa8] sm:$0xff] }
 0xddc   : > { %5604 = vtanh.f32 %v3854_v30 }
 0xddd   : > { %5606 = vtanh.f32 %v3937_v19 }
 0xdde   : > { %5608 = vtanh.f32 %v3935_v29 }
 0xddf   : > { %5610 = vtanh.f32 %v3931_v18  ;;  %v5595_v59 = vpop.eup %5594 }
 0xde0   : > { %5612 = vtanh.f32 %v3929_v31  ;;  %v5123_v31 = vld [vmem:[%s6691_s3 + $0xb0] sm:$0xff] }
 0xde1   : > { %5614 = vtanh.f32 %v3925_v58  ;;  %v5597_v60 = vpop.eup %5596  ;;  %v5124_v58 = vld [vmem:[%s6691_s3 + $0xb8] sm:$0xf] }
 0xde2   : > { %5616 = vtanh.f32 %v3923_v57 }
 0xde3   : > { %v5599_v61 = vpop.eup %5598 }
 0xde5   : > { %v5601_v8 = vpop.eup %5600 }
 0xde7   : > { %v5603_v10 = vpop.eup %5602 }
 0xde9   : > { %v5605_v62 = vpop.eup %5604 }
 0xdea   : > { %v5607_v3 = vpop.eup %5606  ;;  %5112 = vmatprep.subr.msk.mxu0 %vm406_vm0, %v5605_v62  ;;  %v4185_v62 = vpop.permute.xlu1 %4184 }
 0xdeb   : > { %v5609_v21 = vpop.eup %5608  ;;  %5117 = vmatprep.subr.msk.mxu1 %vm406_vm0, %v5607_v3  ;;  %5113 = vmatpush1.msk.msra.mxu0 %vm406_vm0, %v5603_v10 }
 0xdec   : > { %v5611_v22 = vpop.eup %5610  ;;  %5118 = vmatpush1.msk.msra.mxu1 %vm406_vm0, %v5609_v21  ;;  %4021 = vmatprep.subr.mxu0 %v5601_v8 }
 0xded   : > { %v5613_v4 = vpop.eup %5612  ;;  %4104 = vmatprep.subr.mxu1 %v5611_v22  ;;  %4022 = vmatpush1.msra.mxu0 %v5599_v61 }
 0xdee   : > { %v5615_v32 = vpop.eup %5614  ;;  %4105 = vmatpush1.msra.mxu1 %v5613_v4  ;;  %4023 = vmatprep.subr.mxu0 %v5597_v60 }
 0xdef   : > { %v5617_v33 = vpop.eup %5616  ;;  %4106 = vmatprep.subr.mxu1 %v5615_v32  ;;  %4024 = vmatpush1.msra.mxu0 %v5595_v59 }
 0xdf0   : > { %4107 = vmatpush1.msra.mxu1 %v5617_v33  ;;  %5114 = vmatmul.mubr.msk.f32.vlgmr.msra.gmra.mxu0 %vm396_vm1, %v5106_v5 }
 0xdf1   : > { %5119 = vmatmul.mubr.msk.f32.vlgmr.msra.gmra.mxu1 %vm396_vm1, %v5106_v5  ;;  %4063 = vmatprep.mubr.f32.mxu0 %v5754_v35 }
 0xdf2   : > { %4146 = vmatprep.mubr.f32.mxu1 %v5754_v35 }
 0xdf4   : > { %5115 = vmatmul.mubr.msk.f32.gmra.mxu0 %vm396_vm1, %v5107_v13 }
 0xdf5   : > { %5120 = vmatmul.mubr.msk.f32.gmra.mxu1 %vm396_vm1, %v5107_v13  ;;  %4069 = vmatprep.mubr.f32.mxu0 %v5754_v35 }
 0xdf6   : > { %4152 = vmatprep.mubr.f32.mxu1 %v5754_v35 }
 0xdf8   : > { %5116 = vmatmul.mubr.msk.f32.gmra.mxu0 %vm396_vm1, %v5108_v34 }
 0xdf9   : > { %5121 = vmatmul.mubr.msk.f32.gmra.mxu1 %vm396_vm1, %v5108_v34  ;;  %4277 = vmatprep.mubr.f32.mxu0 %v5754_v35 }
 0xdfa   : > { %4360 = vmatprep.mubr.f32.mxu1 %v5754_v35 }
 0xeb0   : > { %v4059_v7 = vpop.f32.mrf.mxu0 }
 0xeb1   : > { %v4142_v38 = vpop.f32.mrf.mxu1  ;;  %v4060_v1 = vadd.f32 %v4059_v7, %v3960_v39 }
 0xeb2   : > { %v4061_v63 = vpop.f32.mrf.mxu0  ;;  %v4143_v51 = vadd.f32 %v4142_v38, %v3960_v39 }
 0xeb3   : > { %v4144_v0 = vpop.f32.mrf.mxu1  ;;  %v4062_v42 = vadd.f32 %v4061_v63, %v3960_v39  ;;  %5618 = vtanh.f32 %v4060_v1 }
 0xeb4   : > { %v4065_v41 = vpop.f32.mrf.mxu0  ;;  %v4145_v50 = vadd.f32 %v4144_v0, %v3960_v39 }
 0xeb5   : > { %v4148_v17 = vpop.f32.mrf.mxu1  ;;  %v4066_v43 = vadd.f32 %v4065_v41, %v6347_v23  ;;  %5620 = vtanh.f32 %v4062_v42 }
 0xeb6   : > { %v4067_v2 = vpop.f32.mrf.mxu0  ;;  %v4149_v14 = vadd.f32 %v4148_v17, %v6347_v23 }
 0xeb7   : > { %v4068_v54 = vadd.f32 %v4067_v2, %v6347_v23  ;;  %v4150_v44 = vpop.f32.mrf.mxu1  ;;  %5622 = vtanh.f32 %v4066_v43 }
 0xeb8   : > { %v4071_v45 = vpop.f32.mrf.mxu0  ;;  %v4151_v15 = vadd.f32 %v4150_v44, %v6347_v23 }
 0xeb9   : > { %v4072_v24 = vadd.f32 %v4071_v45, %v3970_v36  ;;  %v4154_v46 = vpop.f32.mrf.mxu1  ;;  %5624 = vtanh.f32 %v4068_v54 }
 0xeba   : > { %v4073_v47 = vpop.f32.mrf.mxu0  ;;  %v4155_v9 = vadd.f32 %v4154_v46, %v3970_v36 }
 0xebb   : > { %v4074_v12 = vadd.f32 %v4073_v47, %v3970_v36  ;;  %v4156_v48 = vpop.f32.mrf.mxu1  ;;  %5626 = vtanh.f32 %v4072_v24  ;;  %v5138_v47 = vld [vmem:[%s6691_s3 + $0xc0] sm:$0xff] }
 0xebc   : > { %v4157_v16 = vadd.f32 %v4156_v48, %v3970_v36  ;;  %v5139_v48 = vld [vmem:[%s6691_s3 + $0xc8] sm:$0xff] }
 0xebd   : > { %5628 = vtanh.f32 %v4074_v12 }
 0xebe   : > { %5630 = vtanh.f32 %v4157_v16  ;;  %v4410_v16 = vpop.permute.xlu1 %4409 }
 0xebf   : > { %5632 = vtanh.f32 %v4155_v9 }
 0xec0   : > { %5634 = vtanh.f32 %v4151_v15  ;;  %v5619_v52 = vpop.eup %5618  ;;  %v5140_v15 = vld [vmem:[%s6691_s3 + $0xd0] sm:$0xf] }
 0xec1   : > { %5636 = vtanh.f32 %v4149_v14 }
 0xec2   : > { %5638 = vtanh.f32 %v4145_v50  ;;  %v5621_v53 = vpop.eup %5620 }
 0xec3   : > { %5640 = vtanh.f32 %v4143_v51 }
 0xec4   : > { %v5623_v55 = vpop.eup %5622 }
 0xec6   : > { %v5625_v56 = vpop.eup %5624 }
 0xec8   : > { %v5627_v6 = vpop.eup %5626 }
 0xeca   : > { %v5629_v25 = vpop.eup %5628 }
 0xecb   : > { %v5631_v28 = vpop.eup %5630  ;;  %5128 = vmatprep.subr.msk.mxu0 %vm406_vm0, %v5629_v25 }
 0xecc   : > { %v5633_v29 = vpop.eup %5632  ;;  %5133 = vmatprep.subr.msk.mxu1 %vm406_vm0, %v5631_v28  ;;  %5129 = vmatpush1.msk.msra.mxu0 %vm406_vm0, %v5627_v6 }
 0xecd   : > { %v5635_v23 = vpop.eup %5634  ;;  %5134 = vmatpush1.msk.msra.mxu1 %vm406_vm0, %v5633_v29  ;;  %4241 = vmatprep.subr.mxu0 %v5625_v56 }
 0xece   : > { %v5637_v30 = vpop.eup %5636  ;;  %4324 = vmatprep.subr.mxu1 %v5635_v23  ;;  %4242 = vmatpush1.msra.mxu0 %v5623_v55 }
 0xecf   : > { %v5639_v18 = vpop.eup %5638  ;;  %4325 = vmatpush1.msra.mxu1 %v5637_v30  ;;  %4243 = vmatprep.subr.mxu0 %v5621_v53 }
 0xed0   : > { %v5641_v19 = vpop.eup %5640  ;;  %4326 = vmatprep.subr.mxu1 %v5639_v18  ;;  %4244 = vmatpush1.msra.mxu0 %v5619_v52  ;;  %v4400_v52 = vpop.permute.xlu1 %4399 }
 0xed1   : > { %4327 = vmatpush1.msra.mxu1 %v5641_v19  ;;  %5130 = vmatmul.mubr.msk.f32.vlgmr.msra.gmra.mxu0 %vm396_vm1, %v5122_v11 }
 0xed2   : > { %5135 = vmatmul.mubr.msk.f32.vlgmr.msra.gmra.mxu1 %vm396_vm1, %v5122_v11  ;;  %4283 = vmatprep.mubr.f32.mxu0 %v5754_v35 }
 0xed3   : > { %4366 = vmatprep.mubr.f32.mxu1 %v5754_v35 }
 0xed5   : > { %5131 = vmatmul.mubr.msk.f32.gmra.mxu0 %vm396_vm1, %v5123_v31 }
 0xed6   : > { %5136 = vmatmul.mubr.msk.f32.gmra.mxu1 %vm396_vm1, %v5123_v31  ;;  %4289 = vmatprep.mubr.f32.mxu0 %v5754_v35 }
 0xed7   : > { %4372 = vmatprep.mubr.f32.mxu1 %v5754_v35 }
 0xed9   : > { %5132 = vmatmul.mubr.msk.f32.gmra.mxu0 %vm396_vm1, %v5124_v58 }
 0xeda   : > { %5137 = vmatmul.mubr.msk.f32.gmra.mxu1 %vm396_vm1, %v5124_v58  ;;  %4497 = vmatprep.mubr.f32.mxu0 %v5754_v35 }
 0xedb   : > { %4580 = vmatprep.mubr.f32.mxu1 %v5754_v35 }
 0xf91   : > { %v4279_v57 = vpop.f32.mrf.mxu0 }
 0xf92   : > { %v4362_v59 = vpop.f32.mrf.mxu1  ;;  %v4280_v8 = vadd.f32 %v4279_v57, %v6351_v27 }
 0xf93   : > { %v4281_v60 = vpop.f32.mrf.mxu0  ;;  %v4363_v42 = vadd.f32 %v4362_v59, %v6351_v27 }
 0xf94   : > { %v4364_v61 = vpop.f32.mrf.mxu1  ;;  %v4282_v3 = vadd.f32 %v4281_v60, %v6351_v27  ;;  %5642 = vtanh.f32 %v4280_v8 }
 0xf95   : > { %v4285_v10 = vpop.f32.mrf.mxu0  ;;  %v4365_v41 = vadd.f32 %v4364_v61, %v6351_v27 }
 0xf96   : > { %v4368_v21 = vpop.f32.mrf.mxu1  ;;  %v4286_v22 = vadd.f32 %v4285_v10, %v4185_v62  ;;  %5644 = vtanh.f32 %v4282_v3 }
 0xf97   : > { %v4287_v4 = vpop.f32.mrf.mxu0  ;;  %v4369_v1 = vadd.f32 %v4368_v21, %v4185_v62 }
 0xf98   : > { %v4288_v5 = vadd.f32 %v4287_v4, %v4185_v62  ;;  %v4370_v32 = vpop.f32.mrf.mxu1  ;;  %5646 = vtanh.f32 %v4286_v22 }
 0xf99   : > { %v4291_v33 = vpop.f32.mrf.mxu0  ;;  %v4371_v39 = vadd.f32 %v4370_v32, %v4185_v62 }
 0xf9a   : > { %v4292_v13 = vadd.f32 %v4291_v33, %v6349_v26  ;;  %v4374_v34 = vpop.f32.mrf.mxu1  ;;  %5648 = vtanh.f32 %v4288_v5 }
 0xf9b   : > { %v4293_v36 = vpop.f32.mrf.mxu0  ;;  %v4375_v7 = vadd.f32 %v4374_v34, %v6349_v26 }
 0xf9c   : > { %v4294_v38 = vadd.f32 %v4293_v36, %v6349_v26  ;;  %v4376_v63 = vpop.f32.mrf.mxu1  ;;  %5650 = vtanh.f32 %v4292_v13 }
 0xf9d   : > { %v4377_v0 = vadd.f32 %v4376_v63, %v6349_v26 }
 0xf9e   : > { %5652 = vtanh.f32 %v4294_v38 }
 0xf9f   : > { %5654 = vtanh.f32 %v4377_v0 }
 0xfa0   : > { %5656 = vtanh.f32 %v4375_v7  ;;  %v5690_v7 = vld [vmem:[%s6693_s5] sm:$0x1] }
 0xfa1   : > { %5658 = vtanh.f32 %v4371_v39  ;;  %v5643_v17 = vpop.eup %5642 }
 0xfa2   : > { %5660 = vtanh.f32 %v4369_v1 }
 0xfa3   : > { %5662 = vtanh.f32 %v4365_v41  ;;  %v5645_v43 = vpop.eup %5644 }
 0xfa4   : > { %5664 = vtanh.f32 %v4363_v42 }
 0xfa5   : > { %v5647_v2 = vpop.eup %5646 }
 0xfa7   : > { %v5649_v54 = vpop.eup %5648 }
 0xfa9   : > { %v5651_v44 = vpop.eup %5650 }
 0xfab   : > { %v5653_v45 = vpop.eup %5652 }
 0xfac   : > { %v5655_v24 = vpop.eup %5654  ;;  %5144 = vmatprep.subr.msk.mxu0 %vm406_vm0, %v5653_v45 }
 0xfad   : > { %v5657_v26 = vpop.eup %5656  ;;  %5149 = vmatprep.subr.msk.mxu1 %vm406_vm0, %v5655_v24  ;;  %5145 = vmatpush1.msk.msra.mxu0 %vm406_vm0, %v5651_v44 }
 0xfae   : > { %v5659_v27 = vpop.eup %5658  ;;  %5150 = vmatpush1.msk.msra.mxu1 %vm406_vm0, %v5657_v26  ;;  %4461 = vmatprep.subr.mxu0 %v5649_v54 }
 0xfaf   : > { %v5661_v46 = vpop.eup %5660  ;;  %4544 = vmatprep.subr.mxu1 %v5659_v27  ;;  %4462 = vmatpush1.msra.mxu0 %v5647_v2 }
 0xfb0   : > { %v5663_v9 = vpop.eup %5662  ;;  %4545 = vmatpush1.msra.mxu1 %v5661_v46  ;;  %4463 = vmatprep.subr.mxu0 %v5645_v43 }
 0xfb1   : > { %v5665_v12 = vpop.eup %5664  ;;  %4546 = vmatprep.subr.mxu1 %v5663_v9  ;;  %4464 = vmatpush1.msra.mxu0 %v5643_v17 }
 0xfb2   : > { %4547 = vmatpush1.msra.mxu1 %v5665_v12  ;;  %5146 = vmatmul.mubr.msk.f32.vlgmr.msra.gmra.mxu0 %vm396_vm1, %v5138_v47 }
 0xfb3   : > { %5151 = vmatmul.mubr.msk.f32.vlgmr.msra.gmra.mxu1 %vm396_vm1, %v5138_v47  ;;  %4503 = vmatprep.mubr.f32.mxu0 %v5754_v35 }
 0xfb4   : > { %4586 = vmatprep.mubr.f32.mxu1 %v5754_v35 }
 0xfb6   : > { %5147 = vmatmul.mubr.msk.f32.gmra.mxu0 %vm396_vm1, %v5139_v48 }
 0xfb7   : > { %5152 = vmatmul.mubr.msk.f32.gmra.mxu1 %vm396_vm1, %v5139_v48  ;;  %4509 = vmatprep.mubr.f32.mxu0 %v5754_v35 }
 0xfb8   : > { %4592 = vmatprep.mubr.f32.mxu1 %v5754_v35 }
 0xfba   : > { %5148 = vmatmul.mubr.msk.f32.gmra.mxu0 %vm396_vm1, %v5140_v15 }
 0xfbb   : > { %5153 = vmatmul.mubr.msk.f32.gmra.mxu1 %vm396_vm1, %v5140_v15  ;;  %4687 = vmatprep.mubr.f32.mxu0 %v5754_v35 }
 0xfbc   : > { %4758 = vmatprep.mubr.f32.mxu1 %v5754_v35 }
0x1072   : > { %v4499_v14 = vpop.f32.mrf.mxu0 }
0x1073   : > { %v4582_v50 = vpop.f32.mrf.mxu1  ;;  %v4500_v55 = vadd.f32 %v4499_v14, %v4400_v52 }
0x1074   : > { %v4501_v51 = vpop.f32.mrf.mxu0  ;;  %v4583_v10 = vadd.f32 %v4582_v50, %v4400_v52 }
0x1075   : > { %v4584_v53 = vpop.f32.mrf.mxu1  ;;  %v4502_v6 = vadd.f32 %v4501_v51, %v4400_v52  ;;  %5666 = vtanh.f32 %v4500_v55 }
0x1076   : > { %v4505_v56 = vpop.f32.mrf.mxu0  ;;  %v4585_v8 = vadd.f32 %v4584_v53, %v4400_v52 }
0x1077   : > { %v4588_v25 = vpop.f32.mrf.mxu1  ;;  %v4506_v28 = vadd.f32 %v4505_v56, %v6353_v20  ;;  %5668 = vtanh.f32 %v4502_v6 }
0x1078   : > { %v4507_v29 = vpop.f32.mrf.mxu0  ;;  %v4589_v61 = vadd.f32 %v4588_v25, %v6353_v20 }
0x1079   : > { %v4508_v23 = vadd.f32 %v4507_v29, %v6353_v20  ;;  %v4590_v30 = vpop.f32.mrf.mxu1  ;;  %5670 = vtanh.f32 %v4506_v28 }
0x107a   : > { %v4511_v11 = vpop.f32.mrf.mxu0  ;;  %v4591_v59 = vadd.f32 %v4590_v30, %v6353_v20 }
0x107b   : > { %v4512_v35 = vadd.f32 %v4511_v11, %v4410_v16  ;;  %v4594_v18 = vpop.f32.mrf.mxu1  ;;  %5672 = vtanh.f32 %v4508_v23 }
0x107c   : > { %v4513_v19 = vpop.f32.mrf.mxu0  ;;  %v4595_v31 = vadd.f32 %v4594_v18, %v4410_v16 }
0x107d   : > { %v4514_v58 = vadd.f32 %v4513_v19, %v4410_v16  ;;  %v4596_v57 = vpop.f32.mrf.mxu1  ;;  %5674 = vtanh.f32 %v4512_v35 }
0x107e   : > { %v4597_v60 = vadd.f32 %v4596_v57, %v4410_v16 }
0x107f   : > { %5676 = vtanh.f32 %v4514_v58 }
0x1080   : > { %5678 = vtanh.f32 %v4597_v60 }
0x1081   : > { %5680 = vtanh.f32 %v4595_v31 }
0x1082   : > { %5682 = vtanh.f32 %v4591_v59  ;;  %v5667_v62 = vpop.eup %5666 }
0x1083   : > { %5684 = vtanh.f32 %v4589_v61 }
0x1084   : > { %5686 = vtanh.f32 %v4585_v8  ;;  %v5669_v3 = vpop.eup %5668 }
0x1085   : > { %5688 = vtanh.f32 %v4583_v10 }
0x1086   : > { %v5671_v21 = vpop.eup %5670 }
0x1088   : > { %v5673_v22 = vpop.eup %5672 }
0x108a   : > { %v5675_v4 = vpop.eup %5674 }
0x108c   : > { %v5677_v5 = vpop.eup %5676 }
0x108d   : > { %v5679_v32 = vpop.eup %5678  ;;  %5154 = vmatprep.subr.msk.mxu0 %vm406_vm0, %v5677_v5 }
0x108e   : > { %v5681_v33 = vpop.eup %5680  ;;  %5157 = vmatprep.subr.msk.mxu1 %vm406_vm0, %v5679_v32  ;;  %5155 = vmatpush1.msk.msra.mxu0 %vm406_vm0, %v5675_v4 }
0x108f   : > { %v5683_v20 = vpop.eup %5682  ;;  %5158 = vmatpush1.msk.msra.mxu1 %vm406_vm0, %v5681_v33  ;;  %4651 = vmatprep.subr.mxu0 %v5673_v22 }
0x1090   : > { %v5685_v13 = vpop.eup %5684  ;;  %4722 = vmatprep.subr.mxu1 %v5683_v20  ;;  %4652 = vmatpush1.msra.mxu0 %v5671_v21 }
0x1091   : > { %v5687_v34 = vpop.eup %5686  ;;  %4723 = vmatpush1.msra.mxu1 %v5685_v13  ;;  %4653 = vmatprep.subr.mxu0 %v5669_v3 }
0x1092   : > { %v5689_v36 = vpop.eup %5688  ;;  %4724 = vmatprep.subr.mxu1 %v5687_v34  ;;  %4654 = vmatpush1.msra.mxu0 %v5667_v62 }
0x1093   : > { %4725 = vmatpush1.msra.mxu1 %v5689_v36  ;;  %5156 = vmatmul.mubr.msk.f32.vlgmr.msra.gmra.mxu0 %vm396_vm1, %v5690_v7 }
0x1094   : > { %5159 = vmatmul.mubr.msk.f32.vlgmr.msra.gmra.mxu1 %vm396_vm1, %v5690_v7 }
0x1153   : > { %v4689_v38 = vpop.f32.mrf.mxu0 }
0x1154   : > { %v4760_v63 = vpop.f32.mrf.mxu1  ;;  %v4690_v0 = vadd.f32 %v4689_v38, %v6356_v37 }
0x1155   : > { %v4691_v39 = vpop.f32.mrf.mxu0  ;;  %v4761_v42 = vadd.f32 %v4760_v63, %v6356_v37 }
0x1156   : > { %v4692_v1 = vadd.f32 %v4691_v39, %v6356_v37  ;;  %v4762_v41 = vpop.f32.mrf.mxu1 }
0x1157   : > { %v4763_v17 = vadd.f32 %v4762_v41, %v6356_v37 }
0x1158   : > { %v4769_v43 = vcombine.low %v4690_v0, %v4692_v1 }
0x1159   : > { %v4770_v2 = vcombine.low %v4761_v42, %v4763_v17 }
0x115a   : > { %v4777_v54 = vrot.slane %v4769_v43, %v6361_v40 }
0x115b   : > { %v4784_v44 = vrot.slane %v4770_v2, %v6361_v40 }
0x115d   : > { %v4785_v45 = vcombine.low %v4777_v54, %v4784_v44 }
0x115f   : > { %v4792_v24 = vrot.slane %v4785_v45, %v6361_v40 }
0x1161   : > { %4794 = vst.msk [vmem:[%s6377_s21 + $0x4] sm:$0xf] %vm6371_vm2, %v4792_v24 }
0x1162   : > { %5704 = shalt.err (!%p5701_p3)
}
0x1163   : > { %s5705_s10 = scalar_lea.hbm %s4808_s18, 128  ;;  %s5709_s14 = scalar_lea.hbm %s6695_s7, 256 }
0x1164   : > { %p5706_p4 = scmp.ne.s32.totalorder %s4808_s18, %s5705_s10  ;;  %p5710_p9 = scmp.lt.s32.totalorder %s4808_s18, %s6695_s7 }
0x1165   : > { %p5711_p10 = scmp.lt.s32.totalorder %s5709_s14, %s5705_s10 }
0x1166   : > { %p5707_p7 = pnand %p5706_p4, %p5838_p5 }
0x1167   : > { %p5712_p11 = por %p5711_p10, %p5710_p9 }
0x1168   : > { %p5708_p8 = pneg %p5707_p7 }
0x116a   : > { %p5713_p12 = pnand %p5712_p11, %p5708_p8 }
0x116c   : > { %5716 = shalt.err (!%p5713_p12)
}
0x116d   : > { %5166 = dma.vmem_to_hbm [thread:$0]  (%p5838_p5), %s4811_s20, 128, %s4808_s18, %s4796_s24  }
0x116e PF: > { %p5172_p13 = scmp.ge.s32.totalorder %s5751_s29, 2  ;;  %s4822_s16 = sand.u32 1, %s5739_s26  }
0x116f   : > { %s4823_s22 = scalar_lea.sflag [#allocation4], %s4822_s16 }
0x1170   : > { %p5169_p0 = pnand %p5172_p13, %p5842_p6 }
0x1172   : > { %p5170_p1 = pneg %p5169_p0 }
0x1174   : > { %5734 = dma.done.wait (%p5170_p1), %s4823_s22, 128  }
0x1175   : > { %5736 = vsyncadd (%p5170_p1), %s4823_s22, 4294967168  ;;  %p19_p2 = scmp.ge.s32.totalorder %s5825_s8, 4   ;;  %s6700_s26 = smov %s5743_s27 }
0x1176   : > { %s6701_s27 = smov %s5747_s28  ;;  %s6702_s28 = smov %s5836_s11 }
0x1177   : > { %s6703_s29 = smov %s5825_s8  ;;  %21 = sbr.rel (!%p19_p2) target bundleno = 6 (0x6), region = 99 }
0x117c   :  { %4828 = vsyncpa [#allocation4], 1 }
0x117d   :  { %4830 = vsyncpa [#allocation4 + $0x1], 1 }

</bundles_post_ra>
